<compile_context>
chip_gen: v5e
topology: v5e:2x2
jax: 0.10.0
libtpu: 0.0.40
codegen_flags: <defaults>
</compile_context>

<pallas_src>
import functools

import jax
import jax.numpy as jnp
from jax.experimental import pallas as pl
from jax.experimental.pallas import tpu as pltpu


def _round_up(x, m):
    return ((x + m - 1) // m) * m


def _vmem_limit_bytes():
    """Generation-aware VMEM budget: ~3/4 of physical capacity, capped at 96 MiB.

    v5e/v6e (128 MiB physical) -> 96 MiB; v7x (64 MiB physical) -> 48 MiB.
    Falls back to a 48 MiB limit (safe on every generation) if the query fails.
    """
    cap = 64 * 1024 * 1024
    try:
        info = pltpu.get_tpu_info()
        cap = int(getattr(info, "vmem_capacity_bytes", cap) or cap)
    except Exception:
        pass
    return min((cap * 3) // 4, 96 * 1024 * 1024)


def custom_mlp_forward(x, w1, b1, w2, b2, *, block_batch=None):
    """Fused MLP forward: relu(x @ w1 + b1) @ w2 + b2.

    x:  (B, D_in) f32
    w1: (D_in, H) f32   (pre-transposed vs. nn.Linear, i.e. kernel does x @ w1)
    b1: (H,)      f32
    w2: (H, O)    f32
    b2: (O,)      f32
    returns (B, O) f32
    """
    B, D_in = x.shape
    H = w1.shape[1]
    O = w2.shape[1]

    # Feature dims used for the MXU / resident weights: 128-lane multiples
    # (exact zero padding: padded hidden cols have zero weight & bias, so
    # relu(0)=0 contributes nothing through W2; padded output lanes are
    # dropped in-register before the store).
    H_pad = _round_up(max(H, 1), 128)
    O_pad = _round_up(max(O, 1), 128)

    vmem_budget = _vmem_limit_bytes()

    # Single-buffered resident weights/biases (bf16 weights, f32 biases).
    resident_bytes = (D_in * H_pad + H_pad * O_pad) * 2 + (H_pad + O) * 4
    # TODO(synk): if resident_bytes ever exceeds ~1/3 of vmem_budget (very wide
    # MLPs, mainly on v7x's 64 MiB), add a D_in/H-tiled reduction path
    # ("arbitrary" grid axis + f32 VMEM accumulator with pl.when init/finalize)
    # instead of the all-resident-weights design.

    # Rough per-batch-row VMEM cost: double-buffered f32 x & out tiles plus
    # the f32/bf16 intermediates (h, y) inside the kernel body.
    per_row_bytes = 4 * (2 * D_in + 2 * O) + 6 * (H_pad + O_pad)

    # ---- Batch-tile selection -------------------------------------------
    if B <= 8:
        TB = B  # single block equal to the full (tiny) batch dim -> legal.
    else:
        if block_batch is not None:
            # Validate user input: f32 sublane constraint (multiple of 8).
            TB = max(8, _round_up(int(block_batch), 8))
        else:
            avail = max(vmem_budget // 2 - resident_bytes, 8 * per_row_bytes)
            TB = min(1024, avail // per_row_bytes)
            # Keep >= 2 grid steps: both v7x TensorCores get a tile, and
            # single-TC chips still get DMA/compute overlap.
            TB = min(TB, _round_up(pl.cdiv(B, 2), 8))
        TB = max(8, (min(TB, B) // 8) * 8)

    grid_len = pl.cdiv(B, TB)

    # ---- Host-side weight prep (one-time, tiny; x is passed through as-is).
    w1_p = jnp.zeros((D_in, H_pad), jnp.bfloat16).at[:, :H].set(
        w1.astype(jnp.bfloat16))
    b1_p = jnp.zeros((1, H_pad), jnp.float32).at[0, :H].set(
        b1.astype(jnp.float32))
    w2_p = jnp.zeros((H_pad, O_pad), jnp.bfloat16).at[:H, :O].set(
        w2.astype(jnp.bfloat16))
    b2_p = b2.astype(jnp.float32).reshape(1, O)

    # ---- Kernel -----------------------------------------------------------
    def mlp_kernel(x_ref, w1_ref, b1_ref, w2_ref, b2_ref, o_ref):
        # x streams as f32 straight from HBM; cast to bf16 at the MXU
        # boundary (VPU cast, hidden under the matmul) -- no host-side pass.
        xb = x_ref[...].astype(jnp.bfloat16)
        h = jnp.dot(xb, w1_ref[...], preferred_element_type=jnp.float32)
        # Bias + ReLU stay f32 (v5e VPU has no bf16 ALUs).
        h = jnp.maximum(h + b1_ref[...], 0.0)
        y = jnp.dot(h.astype(jnp.bfloat16), w2_ref[...],
                    preferred_element_type=jnp.float32)
        if O != O_pad:
            # Drop padded output lanes in-register: the HBM store is the
            # unpadded (TB, O) block (64x fewer bytes than a 128-wide pad).
            y = y[:, :O]
        o_ref[...] = (y + b2_ref[...]).astype(o_ref.dtype)

    cost = pl.CostEstimate(
        flops=2 * B * (D_in * H + H * O),
        transcendentals=0,
        bytes_accessed=(B * D_in * 4                       # x read (f32)
                        + (D_in * H_pad + H_pad * O_pad) * 2  # weights (bf16)
                        + (H_pad + O) * 4                   # biases (f32)
                        + B * O * 4),                       # output write (f32)
    )

    def _run(single_buffer_weights):
        # Resident operands: constant index map; single-buffered when allowed
        # (default double-buffering silently doubles their VMEM footprint).
        wkw = ({"pipeline_mode": pl.Buffered(1)}
               if single_buffer_weights else {})
        in_specs = [
            # Activations: tiled over batch -> auto double-buffered DMA.
            pl.BlockSpec((TB, D_in), lambda i: (i, 0)),
            pl.BlockSpec((D_in, H_pad), lambda i: (0, 0), **wkw),
            pl.BlockSpec((1, H_pad), lambda i: (0, 0), **wkw),
            pl.BlockSpec((H_pad, O_pad), lambda i: (0, 0), **wkw),
            pl.BlockSpec((1, O), lambda i: (0, 0), **wkw),
        ]
        return pl.pallas_call(
            mlp_kernel,
            out_shape=jax.ShapeDtypeStruct((B, O), jnp.float32),
            grid_spec=pl.GridSpec(
                grid=(grid_len,),
                in_specs=in_specs,
                # Unpadded output block: last dim equals the full array dim
                # (legal even though < 128); ragged last batch tile's OOB rows
                # are masked on writeback by Pallas.
                out_specs=pl.BlockSpec((TB, O), lambda i: (i, 0)),
            ),
            compiler_params=pltpu.CompilerParams(
                # Independent batch tiles -> megacore sharding on v7x.
                dimension_semantics=("parallel",),
                vmem_limit_bytes=vmem_budget,
            ),
            cost_estimate=cost,
        )(x, w1_p, b1_p, w2_p, b2_p)

    try:
        return _run(True)
    except Exception:
        # Fallback for jax versions that reject pipeline_mode on top-level
        # pallas_call BlockSpecs; default double-buffering is still correct.
        return _run(False)


def init_params(key, input_dim, output_dim=2):
    """Deterministic init mirroring nn.Linear's U(-1/sqrt(fan_in), 1/sqrt(fan_in)).

    Matches CustomMLP: hidden_dim is forced to int(input_dim / 2).
    """
    hidden_dim = int(input_dim / 2)
    k1, k2, k3, k4 = jax.random.split(key, 4)
    bound1 = 1.0 / jnp.sqrt(input_dim)
    bound2 = 1.0 / jnp.sqrt(hidden_dim)
    # Stored pre-transposed: (in_features, out_features).
    w1 = jax.random.uniform(k1, (input_dim, hidden_dim), jnp.float32, -bound1, bound1)
    b1 = jax.random.uniform(k2, (hidden_dim,), jnp.float32, -bound1, bound1)
    w2 = jax.random.uniform(k3, (hidden_dim, output_dim), jnp.float32, -bound2, bound2)
    b2 = jax.random.uniform(k4, (output_dim,), jnp.float32, -bound2, bound2)
    return w1, b1, w2, b2


def reference_forward(x, w1, b1, w2, b2):
    # Matches the kernel's bf16-MXU-operand / f32-accumulate numerics
    # (documented precision choice; within 1e-2 of a pure-f32 CustomMLP).
    f32 = jnp.float32
    xb = x.astype(jnp.bfloat16).astype(f32)
    w1b = w1.astype(jnp.bfloat16).astype(f32)
    w2b = w2.astype(jnp.bfloat16).astype(f32)
    h = jnp.maximum(xb @ w1b + b1, 0.0)
    hb = h.astype(jnp.bfloat16).astype(f32)
    return hb @ w2b + b2


if __name__ == "__main__":
    key = jax.random.PRNGKey(0)
    kx, kp = jax.random.split(key)

    batch = 500          # not a tile multiple -> exercises the ragged last tile
    input_dim = 64       # -> hidden_dim = 32
    output_dim = 2

    x = jax.random.normal(kx, (batch, input_dim), jnp.float32)
    w1, b1, w2, b2 = init_params(kp, input_dim, output_dim)

    out = custom_mlp_forward(x, w1, b1, w2, b2)
    out = jax.block_until_ready(out)

    ref = reference_forward(x, w1, b1, w2, b2)
    assert out.shape == (batch, output_dim), out.shape
    max_err = float(jnp.max(jnp.abs(out - ref)))
    assert jnp.allclose(out, ref, atol=2e-2, rtol=2e-2), max_err

    print("KERNEL_OK")
</pallas_src>

<mosaic_0001>
module attributes {stable_mosaic.version = 11 : i64} {
  func.func @mlp_kernel(%arg0: i32, %arg1: memref<256x64xf32, #tpu.memory_space<vmem>>, %arg2: memref<64x128xbf16, #tpu.memory_space<vmem>>, %arg3: memref<1x128xf32, #tpu.memory_space<vmem>>, %arg4: memref<128x128xbf16, #tpu.memory_space<vmem>>, %arg5: memref<1x2xf32, #tpu.memory_space<vmem>>, %arg6: memref<256x2xf32, #tpu.memory_space<vmem>>) attributes {dimension_semantics = [#tpu.dimension_semantics<parallel>], iteration_bounds = array<i64: 2>, scalar_prefetch = 0 : i64, scratch_operands = 0 : i64, tpu.core_type = #tpu.core_type<tc>, window_params = [{transform_indices = @transform_0, window_bounds = array<i64: 256, 64>}, {pipeline_mode = #tpu.pipeline_mode<synchronous>, transform_indices = @transform_1, window_bounds = array<i64: 64, 128>}, {pipeline_mode = #tpu.pipeline_mode<synchronous>, transform_indices = @transform_2, window_bounds = array<i64: 1, 128>}, {pipeline_mode = #tpu.pipeline_mode<synchronous>, transform_indices = @transform_3, window_bounds = array<i64: 128, 128>}, {pipeline_mode = #tpu.pipeline_mode<synchronous>, transform_indices = @transform_4, window_bounds = array<i64: 1, 2>}, {transform_indices = @transform_5, window_bounds = array<i64: 256, 2>}]} {
    %c0 = arith.constant 0 : index
    %c0_0 = arith.constant 0 : index
    %0 = vector.load %arg1[%c0, %c0_0] : memref<256x64xf32, #tpu.memory_space<vmem>>, vector<256x64xf32>
    %1 = arith.truncf %0 : vector<256x64xf32> to vector<256x64xbf16>
    %c0_1 = arith.constant 0 : index
    %c0_2 = arith.constant 0 : index
    %2 = vector.load %arg2[%c0_1, %c0_2] : memref<64x128xbf16, #tpu.memory_space<vmem>>, vector<64x128xbf16>
    %cst = arith.constant dense<0.000000e+00> : vector<256x128xf32>
    %3 = tpu.matmul %1, %2, %cst {dimension_numbers = #tpu.dot_dimension_numbers<[1], [0], [0], [1], [0, 0, 1, 1], [], []>} : vector<256x64xbf16>, vector<64x128xbf16>, vector<256x128xf32> -> vector<256x128xf32>
    %c0_3 = arith.constant 0 : index
    %c0_4 = arith.constant 0 : index
    %4 = vector.load %arg3[%c0_3, %c0_4] : memref<1x128xf32, #tpu.memory_space<vmem>>, vector<1x128xf32>
    %5 = vector.broadcast %4 : vector<1x128xf32> to vector<256x128xf32>
    %6 = arith.addf %3, %5 : vector<256x128xf32>
    %cst_5 = arith.constant 0.000000e+00 : f32
    %7 = vector.broadcast %cst_5 : f32 to vector<256x128xf32>
    %8 = arith.maximumf %6, %7 : vector<256x128xf32>
    %9 = arith.truncf %8 : vector<256x128xf32> to vector<256x128xbf16>
    %c0_6 = arith.constant 0 : index
    %c0_7 = arith.constant 0 : index
    %10 = vector.load %arg4[%c0_6, %c0_7] : memref<128x128xbf16, #tpu.memory_space<vmem>>, vector<128x128xbf16>
    %cst_8 = arith.constant dense<0.000000e+00> : vector<256x128xf32>
    %11 = tpu.matmul %9, %10, %cst_8 {dimension_numbers = #tpu.dot_dimension_numbers<[1], [0], [0], [1], [0, 0, 1, 1], [], []>} : vector<256x128xbf16>, vector<128x128xbf16>, vector<256x128xf32> -> vector<256x128xf32>
    %12 = vector.extract_strided_slice %11 {offsets = [0, 0], sizes = [256, 2], strides = [1, 1]} : vector<256x128xf32> to vector<256x2xf32>
    %c0_9 = arith.constant 0 : index
    %c0_10 = arith.constant 0 : index
    %13 = vector.load %arg5[%c0_9, %c0_10] : memref<1x2xf32, #tpu.memory_space<vmem>>, vector<1x2xf32>
    %14 = vector.broadcast %13 : vector<1x2xf32> to vector<256x2xf32>
    %15 = arith.addf %12, %14 : vector<256x2xf32>
    %c0_11 = arith.constant 0 : index
    %c0_12 = arith.constant 0 : index
    %16 = vector.load %arg6[%c0_11, %c0_12] : memref<256x2xf32, #tpu.memory_space<vmem>>, vector<256x2xf32>
    tpu.vector_store %arg6[%c0_11, %c0_12], %15 {strides = array<i32>} : memref<256x2xf32, #tpu.memory_space<vmem>>, vector<256x2xf32>,
    return
  }
  func.func @transform_0(%arg0: i32) -> (i32, i32) {
    %c0_i32 = arith.constant 0 : i32
    %c0_i32_0 = arith.constant 0 : i32
    return %arg0, %c0_i32 : i32, i32
  }
  func.func @transform_1(%arg0: i32) -> (i32, i32) {
    %c0_i32 = arith.constant 0 : i32
    %c0_i32_0 = arith.constant 0 : i32
    %c0_i32_1 = arith.constant 0 : i32
    return %c0_i32, %c0_i32_0 : i32, i32
  }
  func.func @transform_2(%arg0: i32) -> (i32, i32) {
    %c0_i32 = arith.constant 0 : i32
    %c0_i32_0 = arith.constant 0 : i32
    %c0_i32_1 = arith.constant 0 : i32
    return %c0_i32, %c0_i32_0 : i32, i32
  }
  func.func @transform_3(%arg0: i32) -> (i32, i32) {
    %c0_i32 = arith.constant 0 : i32
    %c0_i32_0 = arith.constant 0 : i32
    %c0_i32_1 = arith.constant 0 : i32
    return %c0_i32, %c0_i32_0 : i32, i32
  }
  func.func @transform_4(%arg0: i32) -> (i32, i32) {
    %c0_i32 = arith.constant 0 : i32
    %c0_i32_0 = arith.constant 0 : i32
    %c0_i32_1 = arith.constant 0 : i32
    return %c0_i32, %c0_i32_0 : i32, i32
  }
  func.func @transform_5(%arg0: i32) -> (i32, i32) {
    %c0_i32 = arith.constant 0 : i32
    %c0_i32_0 = arith.constant 0 : i32
    return %arg0, %c0_i32 : i32, i32
  }
}

module attributes {stable_mosaic.version = 11 : i64} {
  func.func @mlp_kernel(%arg0: i32, %arg1: memref<256x64xf32, #tpu.memory_space<vmem>>, %arg2: memref<64x128xbf16, #tpu.memory_space<vmem>>, %arg3: memref<1x128xf32, #tpu.memory_space<vmem>>, %arg4: memref<128x128xbf16, #tpu.memory_space<vmem>>, %arg5: memref<1x2xf32, #tpu.memory_space<vmem>>, %arg6: memref<256x2xf32, #tpu.memory_space<vmem>>) attributes {dimension_semantics = [#tpu.dimension_semantics<parallel>], iteration_bounds = array<i64: 2>, scalar_prefetch = 0 : i64, scratch_operands = 0 : i64, tpu.core_type = #tpu.core_type<tc>, window_params = [{transform_indices = @transform_0, window_bounds = array<i64: 256, 64>}, {pipeline_mode = #tpu.pipeline_mode<synchronous>, transform_indices = @transform_1, window_bounds = array<i64: 64, 128>}, {pipeline_mode = #tpu.pipeline_mode<synchronous>, transform_indices = @transform_2, window_bounds = array<i64: 1, 128>}, {pipeline_mode = #tpu.pipeline_mode<synchronous>, transform_indices = @transform_3, window_bounds = array<i64: 128, 128>}, {pipeline_mode = #tpu.pipeline_mode<synchronous>, transform_indices = @transform_4, window_bounds = array<i64: 1, 2>}, {transform_indices = @transform_5, window_bounds = array<i64: 256, 2>}]} {
    %c0 = arith.constant 0 : index
    %c0_0 = arith.constant 0 : index
    %0 = vector.load %arg1[%c0, %c0_0] : memref<256x64xf32, #tpu.memory_space<vmem>>, vector<256x64xf32>
    %1 = arith.truncf %0 : vector<256x64xf32> to vector<256x64xbf16>
    %c0_1 = arith.constant 0 : index
    %c0_2 = arith.constant 0 : index
    %2 = vector.load %arg2[%c0_1, %c0_2] : memref<64x128xbf16, #tpu.memory_space<vmem>>, vector<64x128xbf16>
    %cst = arith.constant dense<0.000000e+00> : vector<256x128xf32>
    %3 = tpu.matmul %1, %2, %cst {dimension_numbers = #tpu.dot_dimension_numbers<[1], [0], [0], [1], [0, 0, 1, 1], [], []>} : vector<256x64xbf16>, vector<64x128xbf16>, vector<256x128xf32> -> vector<256x128xf32>
    %c0_3 = arith.constant 0 : index
    %c0_4 = arith.constant 0 : index
    %4 = vector.load %arg3[%c0_3, %c0_4] : memref<1x128xf32, #tpu.memory_space<vmem>>, vector<1x128xf32>
    %5 = vector.broadcast %4 : vector<1x128xf32> to vector<256x128xf32>
    %6 = arith.addf %3, %5 : vector<256x128xf32>
    %cst_5 = arith.constant 0.000000e+00 : f32
    %7 = vector.broadcast %cst_5 : f32 to vector<256x128xf32>
    %8 = arith.maximumf %6, %7 : vector<256x128xf32>
    %9 = arith.truncf %8 : vector<256x128xf32> to vector<256x128xbf16>
    %c0_6 = arith.constant 0 : index
    %c0_7 = arith.constant 0 : index
    %10 = vector.load %arg4[%c0_6, %c0_7] : memref<128x128xbf16, #tpu.memory_space<vmem>>, vector<128x128xbf16>
    %cst_8 = arith.constant dense<0.000000e+00> : vector<256x128xf32>
    %11 = tpu.matmul %9, %10, %cst_8 {dimension_numbers = #tpu.dot_dimension_numbers<[1], [0], [0], [1], [0, 0, 1, 1], [], []>} : vector<256x128xbf16>, vector<128x128xbf16>, vector<256x128xf32> -> vector<256x128xf32>
    %12 = vector.extract_strided_slice %11 {offsets = [0, 0], sizes = [256, 2], strides = [1, 1]} : vector<256x128xf32> to vector<256x2xf32>
    %c0_9 = arith.constant 0 : index
    %c0_10 = arith.constant 0 : index
    %13 = vector.load %arg5[%c0_9, %c0_10] : memref<1x2xf32, #tpu.memory_space<vmem>>, vector<1x2xf32>
    %14 = vector.broadcast %13 : vector<1x2xf32> to vector<256x2xf32>
    %15 = arith.addf %12, %14 : vector<256x2xf32>
    %c0_11 = arith.constant 0 : index
    %c0_12 = arith.constant 0 : index
    %16 = vector.load %arg6[%c0_11, %c0_12] : memref<256x2xf32, #tpu.memory_space<vmem>>, vector<256x2xf32>
    tpu.vector_store %arg6[%c0_11, %c0_12], %15 {strides = array<i32>} : memref<256x2xf32, #tpu.memory_space<vmem>>, vector<256x2xf32>,
    return
  }
  func.func @transform_0(%arg0: i32) -> (i32, i32) {
    %c0_i32 = arith.constant 0 : i32
    %c0_i32_0 = arith.constant 0 : i32
    return %arg0, %c0_i32 : i32, i32
  }
  func.func @transform_1(%arg0: i32) -> (i32, i32) {
    %c0_i32 = arith.constant 0 : i32
    %c0_i32_0 = arith.constant 0 : i32
    %c0_i32_1 = arith.constant 0 : i32
    return %c0_i32, %c0_i32_0 : i32, i32
  }
  func.func @transform_2(%arg0: i32) -> (i32, i32) {
    %c0_i32 = arith.constant 0 : i32
    %c0_i32_0 = arith.constant 0 : i32
    %c0_i32_1 = arith.constant 0 : i32
    return %c0_i32, %c0_i32_0 : i32, i32
  }
  func.func @transform_3(%arg0: i32) -> (i32, i32) {
    %c0_i32 = arith.constant 0 : i32
    %c0_i32_0 = arith.constant 0 : i32
    %c0_i32_1 = arith.constant 0 : i32
    return %c0_i32, %c0_i32_0 : i32, i32
  }
  func.func @transform_4(%arg0: i32) -> (i32, i32) {
    %c0_i32 = arith.constant 0 : i32
    %c0_i32_0 = arith.constant 0 : i32
    %c0_i32_1 = arith.constant 0 : i32
    return %c0_i32, %c0_i32_0 : i32, i32
  }
  func.func @transform_5(%arg0: i32) -> (i32, i32) {
    %c0_i32 = arith.constant 0 : i32
    %c0_i32_0 = arith.constant 0 : i32
    return %arg0, %c0_i32 : i32, i32
  }
}

</mosaic_0001>

<bundles_post_ra>
// kernel: tpu_custom_call.1
= control target key start
LH: loop header
LB: loop body
LE: loop exit
PB: predicated region body
PF: predicated region fallthrough
CT: control target
= control target key end

     0   :  { %s1402_s18 = smov 0   ;;  %s1404_s19 = smov 0   ;;  %s1808_s0 = inlined_call_operand.vmem [shape: f32[500,64], index: 0, kind: input, shape index: {}]   ;;  %s1809_s1 = inlined_call_operand.vmem [shape: bf16[64,128], index: 1, kind: input, shape index: {}]   ;;  %s1810_s2 = inlined_call_operand.vmem [shape: f32[1,128], index: 2, kind: input, shape index: {}]   ;;  %s1811_s3 = inlined_call_operand.vmem [shape: bf16[128,128], index: 3, kind: input, shape index: {}]   ;;  %s1812_s4 = inlined_call_operand.vmem [shape: f32[1,2], index: 4, kind: input, shape index: {}]   ;;  %s1813_s5 = inlined_call_operand.vmem [shape: f32[500,2], index: 5, kind: output, shape index: {}]  }
   0x1   :  { %s1406_s20 = smov 0  }
   0x2 LB: > { %s1415_s21 = sadd.s32 4294967295, %s1338_s20   ;;  %s1417_s22 = sadd.s32 1, %s1338_s20   ;;  %s1338_s20 = sphi %s1406_s20, %s1822_s20   ;;  %s1334_s19 = sphi %s1404_s19, %s1821_s19   ;;  %s1330_s18 = sphi %s1402_s18, %s1820_s18  }
   0x3   : > { %s129_s23 = ssub.s32 %s1338_s20, %s1417_s22  ;;  %s132_s24 = sadd.s32 1, %s1334_s19 }
   0x4   : > { %p130_p0 = scmp.eq.s32.totalorder %s129_s23, 0  ;;  %p142_p1 = scmp.ne.s32.totalorder %s1334_s19, %s1330_s18 }
   0x5   : > { %p143_p2 = scmp.eq.s32.totalorder %s1415_s21, 1  ;;  %p1082_p3 = scmp.ge.s32.totalorder %s1338_s20, 1 }
   0x6   : > { %s1425_s25 = scalar_select %p130_p0, %s1334_s19, %s132_s24  }
   0x7   : > { %p1427_p4 = por %p143_p2, %p142_p1  ;;  %p196_p5 = scmp.lt.s32.totalorder %s1338_s20, 3 }
   0x9   : > { %p197_p6 = pnand %p1082_p3, %p196_p5 }
   0xa   : > { %s1435_s29 = sshll.u32 (!%p197_p6), %s1415_s21, 5 }
   0xb   : > { %200 = sbr.rel (%p197_p6) target bundleno = 619 (0x26b), region = 40  ;;  %p232_p7 = scmp.lt.s32.totalorder (!%p197_p6), %s1435_s29, 62 }
  0x10   : > { %v1170_v0 = vld [vmem:[%s1809_s1 + $0x18] sm:$0xff]  ;;  %v1169_v1 = vld [vmem:[%s1809_s1 + $0x10] sm:$0xff]  ;;  %s233_s7 = scalar_select %p232_p7, %s1435_s29, 62  ;;  %v1168_v2 = vld [vmem:[%s1809_s1 + $0x8] sm:$0xff]  ;;  %vm331_vm0 = vcmask 523264   ;;  %vm706_vm1 = vcmask 15360  }
  0x11   : > { %384 = vmatpush.bf16.msra.mxu0 %v1170_v0  ;;  %1182 = vmatpush.bf16.msra.mxu3 %v1170_v0  ;;  %v1167_v3 = vld [vmem:[%s1809_s1] sm:$0xff]  ;;  %v1178_v19 = vld [vmem:[%s1811_s3 + $0x38] sm:$0xff]  ;;  %v1177_v23 = vld [vmem:[%s1811_s3 + $0x30] sm:$0xff]  ;;  %s747_s24 = ssub.s32 (%p1427_p4), 63, %s1435_s29  ;;  %s1179_s27 = sshll.u32 (%p1427_p4), %s1415_s21, 8 }
  0x12   : > { %s1085_s8 = sshll.u32 %s233_s7, 3  ;;  %581 = vmatpush.bf16.msra.mxu1 %v1178_v19  ;;  %1186 = vmatpush.bf16.msra.mxu2 %v1178_v19  ;;  %v1176_v24 = vld [vmem:[%s1811_s3 + $0x28] sm:$0xff]  ;;  %v1175_v25 = vld [vmem:[%s1811_s3 + $0x20] sm:$0xff]  ;;  %v1174_v28 = vld [vmem:[%s1811_s3 + $0x18] sm:$0xff]  ;;  %p748_p8 = scmp.lt.s32.totalorder (%p1427_p4), %s747_s24, 32 }
  0x13   : > { %s1448_s13 = scalar_lea.vmem %s1808_s0, %s1085_s8  ;;  %v1173_v30 = vld [vmem:[%s1811_s3 + $0x10] sm:$0xff]  ;;  %v1172_v34 = vld [vmem:[%s1811_s3 + $0x8] sm:$0xff]  ;;  %v1171_v35 = vld [vmem:[%s1811_s3] sm:$0xff]  ;;  %s1673_s6 = scalar_lea.vmem (%p1427_p4), %s1813_s5, %s1179_s27  }
  0x14   : > { %v247_v4 = vld [vmem:[%s1448_s13] sm:$0xff]  ;;  %v248_v5 = vld [vmem:[%s1448_s13 + $0x8] sm:$0xff]  ;;  %v249_v7 = vld [vmem:[%s1448_s13 + $0x10] sm:$0xff] }
  0x15   : > { %385 = vmatpush.bf16.msra.mxu0 %v1169_v1  ;;  %1183 = vmatpush.bf16.msra.mxu3 %v1169_v1  ;;  %v279_v6 = vpack.c.bf16 %v248_v5, %v247_v4  ;;  %v250_v8 = vld [vmem:[%s1448_s13 + $0x18] sm:$0xff]  ;;  %v251_v10 = vld [vmem:[%s1448_s13 + $0x20] sm:$0xff]  ;;  %v252_v11 = vld [vmem:[%s1448_s13 + $0x28] sm:$0xff] }
  0x16   : > { %v280_v9 = vpack.c.bf16 %v250_v8, %v249_v7  ;;  %v281_v12 = vpack.c.bf16 %v252_v11, %v251_v10  ;;  %v253_v13 = vld [vmem:[%s1448_s13 + $0x30] sm:$0xff]  ;;  %v254_v14 = vld [vmem:[%s1448_s13 + $0x38] sm:$0xff]  ;;  %v255_v16 = vld [vmem:[%s1448_s13 + $0x40] sm:$0xff]  ;;  %582 = vmatpush.bf16.msra.mxu1 %v1177_v23  ;;  %1187 = vmatpush.bf16.msra.mxu2 %v1177_v23 }
  0x17   : > { %v282_v15 = vpack.c.bf16 %v254_v14, %v253_v13  ;;  %v256_v17 = vld [vmem:[%s1448_s13 + $0x48] sm:$0xff]  ;;  %v257_v20 = vld [vmem:[%s1448_s13 + $0x50] sm:$0xff]  ;;  %v258_v21 = vld [vmem:[%s1448_s13 + $0x58] sm:$0xff] }
  0x18   : > { %v283_v18 = vpack.c.bf16 %v256_v17, %v255_v16  ;;  %v284_v22 = vpack.c.bf16 %v258_v21, %v257_v20  ;;  %v259_v26 = vld [vmem:[%s1448_s13 + $0x60] sm:$0xff]  ;;  %v260_v27 = vld [vmem:[%s1448_s13 + $0x68] sm:$0xff]  ;;  %v265_v31 = vld [vmem:[%s1448_s13 + $0x90] sm:$0xff] }
  0x19   : > { %386 = vmatpush.bf16.msra.mxu0 %v1168_v2  ;;  %1184 = vmatpush.bf16.msra.mxu3 %v1168_v2  ;;  %v285_v29 = vpack.c.bf16 %v260_v27, %v259_v26  ;;  %v266_v32 = vld [vmem:[%s1448_s13 + $0x98] sm:$0xff]  ;;  %v261_v36 = vld [vmem:[%s1448_s13 + $0x70] sm:$0xff]  ;;  %v267_v39 = vld [vmem:[%s1448_s13 + $0xa0] sm:$0xff] }
  0x1a   : > { %583 = vmatpush.bf16.msra.mxu1 %v1176_v24  ;;  %1188 = vmatpush.bf16.msra.mxu2 %v1176_v24  ;;  %v288_v33 = vpack.c.bf16 %v266_v32, %v265_v31  ;;  %v262_v37 = vld [vmem:[%s1448_s13 + $0x78] sm:$0xff]  ;;  %v268_v40 = vld [vmem:[%s1448_s13 + $0xa8] sm:$0xff]  ;;  %v263_v42 = vld [vmem:[%s1448_s13 + $0x80] sm:$0xff] }
  0x1b   : > { %v286_v38 = vpack.c.bf16 %v262_v37, %v261_v36  ;;  %v289_v41 = vpack.c.bf16 %v268_v40, %v267_v39  ;;  %v264_v43 = vld [vmem:[%s1448_s13 + $0x88] sm:$0xff]  ;;  %v269_v46 = vld [vmem:[%s1448_s13 + $0xb0] sm:$0xff]  ;;  %v270_v47 = vld [vmem:[%s1448_s13 + $0xb8] sm:$0xff] }
  0x1c   : > { %v287_v44 = vpack.c.bf16 %v264_v43, %v263_v42  ;;  %v1514_v48 = vld [vmem:[%s1810_s2] ss:$0 sm:$0xff]  ;;  %v290_v49 = vpack.c.bf16 %v270_v47, %v269_v46  ;;  %v272_v58 = vld [vmem:[%s1448_s13 + $0xc8] sm:$0xff]  ;;  %v274_v4 = vld [vmem:[%s1448_s13 + $0xd8] sm:$0xff] }
  0x1d   : > { %387 = vmatpush.bf16.msra.mxu0 %v1167_v3  ;;  %1185 = vmatpush.bf16.msra.mxu3 %v1167_v3  ;;  %v271_v57 = vld [vmem:[%s1448_s13 + $0xc0] sm:$0xff]  ;;  %v273_v3 = vld [vmem:[%s1448_s13 + $0xd0] sm:$0xff]  ;;  %v276_v14 = vld [vmem:[%s1448_s13 + $0xe8] sm:$0xff] }
  0x1e   : > { %584 = vmatpush.bf16.msra.mxu1 %v1175_v25  ;;  %1189 = vmatpush.bf16.msra.mxu2 %v1175_v25  ;;  %v291_v59 = vpack.c.bf16 %v272_v58, %v271_v57  ;;  %v292_v5 = vpack.c.bf16 %v274_v4, %v273_v3  ;;  %v275_v13 = vld [vmem:[%s1448_s13 + $0xe0] sm:$0xff]  ;;  %v277_v23 = vld [vmem:[%s1448_s13 + $0xf0] sm:$0xff]  ;;  %v278_v24 = vld [vmem:[%s1448_s13 + $0xf8] sm:$0xff]  ;;  %s224_s13 = sand.u32 1, %s1330_s18  }
  0x1f   : > { %v294_v25 = vpack.c.bf16 %v278_v24, %v277_v23  ;;  %s1083_s17 = sshll.u32 %s224_s13, 8 }
  0x20   : > { %1102 = vmatmul.msk.bf16.vlgmr.msra.gmra.mxu0 %vm331_vm0, %v279_v6  ;;  %1111 = vmatmul.msk.bf16.vlgmr.msra.gmra.mxu3 %vm331_vm0, %v288_v33  ;;  %s1555_s18 = scalar_lea.vmem [#allocation2], %s1083_s17  }
  0x22   : > { %585 = vmatpush.bf16.msra.mxu1 %v1174_v28  ;;  %1190 = vmatpush.bf16.msra.mxu2 %v1174_v28 }
  0x26   : > { %586 = vmatpush.bf16.msra.mxu1 %v1173_v30  ;;  %1191 = vmatpush.bf16.msra.mxu2 %v1173_v30 }
  0x2a   : > { %587 = vmatpush.bf16.msra.mxu1 %v1172_v34  ;;  %1192 = vmatpush.bf16.msra.mxu2 %v1172_v34 }
  0x2e   : > { %588 = vmatpush.bf16.msra.mxu1 %v1171_v35  ;;  %1193 = vmatpush.bf16.msra.mxu2 %v1171_v35 }
  0x30   : > { %1103 = vmatmul.msk.bf16.gmra.mxu0 %vm331_vm0, %v280_v9  ;;  %1112 = vmatmul.msk.bf16.gmra.mxu3 %vm331_vm0, %v289_v41 }
  0x40   : > { %1104 = vmatmul.msk.bf16.gmra.mxu0 %vm331_vm0, %v281_v12  ;;  %1113 = vmatmul.msk.bf16.gmra.mxu3 %vm331_vm0, %v290_v49 }
  0x50   : > { %1105 = vmatmul.msk.bf16.gmra.mxu0 %vm331_vm0, %v282_v15  ;;  %1114 = vmatmul.msk.bf16.gmra.mxu3 %vm331_vm0, %v291_v59  ;;  %v293_v15 = vpack.c.bf16 %v276_v14, %v275_v13 }
  0x60   : > { %1106 = vmatmul.msk.bf16.gmra.mxu0 %vm331_vm0, %v283_v18  ;;  %1115 = vmatmul.msk.bf16.gmra.mxu3 %vm331_vm0, %v292_v5 }
  0x70   : > { %1107 = vmatmul.msk.bf16.gmra.mxu0 %vm331_vm0, %v284_v22  ;;  %1116 = vmatmul.msk.bf16.gmra.mxu3 %vm331_vm0, %v293_v15 }
  0x80   : > { %1108 = vmatmul.msk.bf16.gmra.mxu0 %vm331_vm0, %v285_v29  ;;  %1117 = vmatmul.msk.bf16.gmra.mxu3 %vm331_vm0, %v294_v25 }
  0x90   : > { %1109 = vmatmul.msk.bf16.gmra.mxu0 %vm331_vm0, %v286_v38 }
  0x9d   : > { %v389_v45 = vpop.f32.mrf.mxu0 }
  0x9e   : > { %v390_v50 = vadd.f32 %v1514_v48, %v389_v45 }
  0xa0   : > { %1110 = vmatmul.msk.bf16.gmra.mxu0 %vm331_vm0, %v287_v44  ;;  %v469_v53 = vmax.f32 %v390_v50, 0.0 }
  0xa3   : > { %v434_v47 = vpop.f32.mrf.mxu3 }
  0xa4   : > { %v435_v5 = vadd.f32 %v1514_v48, %v434_v47 }
  0xa5   : > { %v391_v51 = vpop.f32.mrf.mxu0 }
  0xa6   : > { %v392_v52 = vadd.f32 %v1514_v48, %v391_v51 }
  0xa8   : > { %v470_v54 = vmax.f32 %v392_v52, 0.0 }
  0xaa   : > { %v501_v55 = vpack.c.bf16 %v470_v54, %v469_v53 }
  0xab   : > { %v436_v52 = vpop.f32.mrf.mxu3 }
  0xac   : > { %589 = vmatmul.bf16.vlgmr.msra.gmra.mxu1 %v501_v55 }
  0xad   : > { %v394_v56 = vpop.f32.mrf.mxu0 }
  0xae   : > { %v395_v60 = vadd.f32 %v1514_v48, %v394_v56 }
  0xb0   : > { %v471_v63 = vmax.f32 %v395_v60, 0.0 }
  0xb3   : > { %v439_v57 = vpop.f32.mrf.mxu3 }
  0xb5   : > { %v396_v61 = vpop.f32.mrf.mxu0 }
  0xb6   : > { %v397_v62 = vadd.f32 %v1514_v48, %v396_v61  ;;  %v1552_v61 = vld [vmem:[%s1812_s4] ss:$0 sm:$0xff] }
  0xb8   : > { %v472_v0 = vmax.f32 %v397_v62, 0.0 }
  0xba   : > { %v502_v1 = vpack.c.bf16 %v472_v0, %v471_v63 }
  0xbb   : > { %v441_v3 = vpop.f32.mrf.mxu3 }
  0xbc   : > { %594 = vmatmul.bf16.gmra.mxu1 %v502_v1 }
  0xbd   : > { %v399_v2 = vpop.f32.mrf.mxu0 }
  0xbe   : > { %v400_v6 = vadd.f32 %v1514_v48, %v399_v2 }
  0xc0   : > { %v473_v9 = vmax.f32 %v400_v6, 0.0  ;;  %v437_v6 = vadd.f32 %v1514_v48, %v436_v52 }
  0xc5   : > { %v401_v7 = vpop.f32.mrf.mxu0 }
  0xc6   : > { %v402_v8 = vadd.f32 %v1514_v48, %v401_v7 }
  0xc8   : > { %v474_v10 = vmax.f32 %v402_v8, 0.0  ;;  %v444_v8 = vpop.f32.mrf.mxu3 }
  0xca   : > { %v503_v11 = vpack.c.bf16 %v474_v10, %v473_v9  ;;  %v487_v9 = vmax.f32 %v435_v5, 0.0  ;;  %v488_v10 = vmax.f32 %v437_v6, 0.0 }
  0xcc   : > { %599 = vmatmul.bf16.gmra.mxu1 %v503_v11  ;;  %v510_v13 = vpack.c.bf16 %v488_v10, %v487_v9 }
  0xcd   : > { %v404_v12 = vpop.f32.mrf.mxu0 }
  0xce   : > { %v405_v16 = vadd.f32 %v1514_v48, %v404_v12 }
  0xd0   : > { %v475_v19 = vmax.f32 %v405_v16, 0.0  ;;  %v446_v14 = vpop.f32.mrf.mxu3  ;;  %v440_v16 = vadd.f32 %v1514_v48, %v439_v57 }
  0xd5   : > { %v406_v17 = vpop.f32.mrf.mxu0 }
  0xd6   : > { %v407_v18 = vadd.f32 %v1514_v48, %v406_v17  ;;  %v442_v17 = vadd.f32 %v1514_v48, %v441_v3 }
  0xd8   : > { %v476_v20 = vmax.f32 %v407_v18, 0.0 }
  0xda   : > { %v504_v21 = vpack.c.bf16 %v476_v20, %v475_v19  ;;  %v489_v19 = vmax.f32 %v440_v16, 0.0  ;;  %v490_v20 = vmax.f32 %v442_v17, 0.0 }
  0xdc   : > { %604 = vmatmul.bf16.gmra.mxu1 %v504_v21  ;;  %v511_v24 = vpack.c.bf16 %v490_v20, %v489_v19 }
  0xdd   : > { %v409_v22 = vpop.f32.mrf.mxu0 }
  0xde   : > { %v410_v26 = vadd.f32 %v1514_v48, %v409_v22  ;;  %v449_v22 = vpop.f32.mrf.mxu3 }
  0xe0   : > { %v477_v29 = vmax.f32 %v410_v26, 0.0  ;;  %v445_v26 = vadd.f32 %v1514_v48, %v444_v8 }
  0xe5   : > { %v411_v27 = vpop.f32.mrf.mxu0 }
  0xe6   : > { %v412_v28 = vadd.f32 %v1514_v48, %v411_v27  ;;  %v447_v27 = vadd.f32 %v1514_v48, %v446_v14 }
  0xe8   : > { %v478_v30 = vmax.f32 %v412_v28, 0.0 }
  0xea   : > { %v505_v31 = vpack.c.bf16 %v478_v30, %v477_v29  ;;  %v451_v29 = vpop.f32.mrf.mxu3  ;;  %v491_v30 = vmax.f32 %v445_v26, 0.0 }
  0xec   : > { %609 = vmatmul.bf16.gmra.mxu1 %v505_v31  ;;  %v492_v31 = vmax.f32 %v447_v27, 0.0 }
  0xed   : > { %v414_v32 = vpop.f32.mrf.mxu0 }
  0xee   : > { %v415_v33 = vadd.f32 %v1514_v48, %v414_v32 }
  0xf0   : > { %v479_v36 = vmax.f32 %v415_v33, 0.0 }
  0xf5   : > { %v416_v34 = vpop.f32.mrf.mxu0 }
  0xf6   : > { %v417_v35 = vadd.f32 %v1514_v48, %v416_v34  ;;  %v512_v34 = vpack.c.bf16 %v492_v31, %v491_v30 }
  0xf8   : > { %v480_v37 = vmax.f32 %v417_v35, 0.0  ;;  %v454_v35 = vpop.f32.mrf.mxu3 }
  0xfa   : > { %v506_v38 = vpack.c.bf16 %v480_v37, %v479_v36  ;;  %v450_v37 = vadd.f32 %v1514_v48, %v449_v22 }
  0xfc   : > { %614 = vmatmul.bf16.gmra.mxu1 %v506_v38  ;;  %v452_v38 = vadd.f32 %v1514_v48, %v451_v29 }
  0xfd   : > { %v419_v39 = vpop.f32.mrf.mxu0 }
  0xfe   : > { %v420_v40 = vadd.f32 %v1514_v48, %v419_v39 }
 0x100   : > { %v481_v43 = vmax.f32 %v420_v40, 0.0  ;;  %v493_v40 = vmax.f32 %v450_v37, 0.0 }
 0x105   : > { %v421_v41 = vpop.f32.mrf.mxu0 }
 0x106   : > { %v422_v42 = vadd.f32 %v1514_v48, %v421_v41  ;;  %v494_v41 = vmax.f32 %v452_v38, 0.0 }
 0x108   : > { %v482_v44 = vmax.f32 %v422_v42, 0.0  ;;  %v456_v42 = vpop.f32.mrf.mxu3 }
 0x10a   : > { %v507_v45 = vpack.c.bf16 %v482_v44, %v481_v43 }
 0x10c   : > { %619 = vmatmul.bf16.gmra.mxu1 %v507_v45  ;;  %v513_v45 = vpack.c.bf16 %v494_v41, %v493_v40 }
 0x10d   : > { %v424_v46 = vpop.f32.mrf.mxu0 }
 0x10e   : > { %v425_v49 = vadd.f32 %v1514_v48, %v424_v46 }
 0x110   : > { %v483_v53 = vmax.f32 %v425_v49, 0.0  ;;  %v459_v47 = vpop.f32.mrf.mxu3  ;;  %v455_v49 = vadd.f32 %v1514_v48, %v454_v35 }
 0x112   : > { %v495_v52 = vmax.f32 %v455_v49, 0.0 }
 0x115   : > { %v426_v50 = vpop.f32.mrf.mxu0 }
 0x116   : > { %v427_v51 = vadd.f32 %v1514_v48, %v426_v50  ;;  %v457_v50 = vadd.f32 %v1514_v48, %v456_v42 }
 0x118   : > { %v484_v54 = vmax.f32 %v427_v51, 0.0  ;;  %v461_v57 = vpop.f32.mrf.mxu3 }
 0x11a   : > { %v508_v55 = vpack.c.bf16 %v484_v54, %v483_v53  ;;  %v496_v53 = vmax.f32 %v457_v50, 0.0 }
 0x11c   : > { %624 = vmatmul.bf16.gmra.mxu1 %v508_v55 }
 0x11d   : > { %v429_v56 = vpop.f32.mrf.mxu0 }
 0x11e   : > { %v430_v58 = vadd.f32 %v1514_v48, %v429_v56  ;;  %v514_v56 = vpack.c.bf16 %v496_v53, %v495_v52 }
 0x120   : > { %v485_v62 = vmax.f32 %v430_v58, 0.0 }
 0x125   : > { %v431_v59 = vpop.f32.mrf.mxu0 }
 0x126   : > { %v432_v60 = vadd.f32 %v1514_v48, %v431_v59  ;;  %v460_v59 = vadd.f32 %v1514_v48, %v459_v47 }
 0x128   : > { %v486_v63 = vmax.f32 %v432_v60, 0.0  ;;  %v462_v60 = vadd.f32 %v1514_v48, %v461_v57 }
 0x129   : > { %v590_v0 = vpop.f32.mrf.mxu1 }
 0x12a   : > { %v674_v1 = vadd.f32 %v1552_v61, %v590_v0  ;;  %v509_v2 = vpack.c.bf16 %v486_v63, %v485_v62  ;;  %v464_v63 = vpop.f32.mrf.mxu3  ;;  %v497_v0 = vmax.f32 %v460_v59, 0.0 }
 0x12c   : > { %707 = vst.msk [vmem:[%s1555_s18] sm:$0xff] %vm706_vm1, %v674_v1  ;;  %629 = vmatmul.bf16.vlgmr.msra.gmra.mxu2 %v509_v2  ;;  %v498_v1 = vmax.f32 %v462_v60, 0.0 }
 0x131   : > { %v592_v4 = vpop.f32.mrf.mxu1 }
 0x132   : > { %v675_v7 = vadd.f32 %v1552_v61, %v592_v4  ;;  %v515_v4 = vpack.c.bf16 %v498_v1, %v497_v0  ;;  %v466_v5 = vpop.f32.mrf.mxu3 }
 0x133   : > { %v467_v8 = vadd.f32 %v1514_v48, %v466_v5 }
 0x134   : > { %708 = vst.msk [vmem:[%s1555_s18 + $0x8] sm:$0xff] %vm706_vm1, %v675_v7  ;;  %v465_v7 = vadd.f32 %v1514_v48, %v464_v63 }
 0x136   : > { %v499_v10 = vmax.f32 %v465_v7, 0.0 }
 0x139   : > { %v595_v11 = vpop.f32.mrf.mxu1 }
 0x13a   : > { %v676_v12 = vadd.f32 %v1552_v61, %v595_v11  ;;  %v500_v11 = vmax.f32 %v467_v8, 0.0 }
 0x13c   : > { %709 = vst.msk [vmem:[%s1555_s18 + $0x10] sm:$0xff] %vm706_vm1, %v676_v12  ;;  %634 = vmatmul.bf16.gmra.mxu2 %v510_v13  ;;  %v516_v14 = vpack.c.bf16 %v500_v11, %v499_v10 }
 0x141   : > { %v597_v15 = vpop.f32.mrf.mxu1 }
 0x142   : > { %v677_v18 = vadd.f32 %v1552_v61, %v597_v15 }
 0x144   : > { %710 = vst.msk [vmem:[%s1555_s18 + $0x18] sm:$0xff] %vm706_vm1, %v677_v18 }
 0x149   : > { %v600_v21 = vpop.f32.mrf.mxu1 }
 0x14a   : > { %v678_v23 = vadd.f32 %v1552_v61, %v600_v21 }
 0x14c   : > { %711 = vst.msk [vmem:[%s1555_s18 + $0x20] sm:$0xff] %vm706_vm1, %v678_v23  ;;  %639 = vmatmul.bf16.gmra.mxu2 %v511_v24 }
 0x151   : > { %v602_v25 = vpop.f32.mrf.mxu1 }
 0x152   : > { %v679_v28 = vadd.f32 %v1552_v61, %v602_v25 }
 0x154   : > { %712 = vst.msk [vmem:[%s1555_s18 + $0x28] sm:$0xff] %vm706_vm1, %v679_v28 }
 0x159   : > { %v605_v32 = vpop.f32.mrf.mxu1 }
 0x15a   : > { %v680_v33 = vadd.f32 %v1552_v61, %v605_v32 }
 0x15c   : > { %713 = vst.msk [vmem:[%s1555_s18 + $0x30] sm:$0xff] %vm706_vm1, %v680_v33  ;;  %644 = vmatmul.bf16.gmra.mxu2 %v512_v34 }
 0x161   : > { %v607_v36 = vpop.f32.mrf.mxu1 }
 0x162   : > { %v681_v39 = vadd.f32 %v1552_v61, %v607_v36 }
 0x164   : > { %714 = vst.msk [vmem:[%s1555_s18 + $0x38] sm:$0xff] %vm706_vm1, %v681_v39 }
 0x169   : > { %v610_v43 = vpop.f32.mrf.mxu1 }
 0x16a   : > { %v682_v44 = vadd.f32 %v1552_v61, %v610_v43 }
 0x16c   : > { %715 = vst.msk [vmem:[%s1555_s18 + $0x40] sm:$0xff] %vm706_vm1, %v682_v44  ;;  %649 = vmatmul.bf16.gmra.mxu2 %v513_v45 }
 0x171   : > { %v612_v46 = vpop.f32.mrf.mxu1 }
 0x172   : > { %v683_v51 = vadd.f32 %v1552_v61, %v612_v46 }
 0x174   : > { %716 = vst.msk [vmem:[%s1555_s18 + $0x48] sm:$0xff] %vm706_vm1, %v683_v51 }
 0x179   : > { %v615_v54 = vpop.f32.mrf.mxu1 }
 0x17a   : > { %v684_v55 = vadd.f32 %v1552_v61, %v615_v54 }
 0x17c   : > { %717 = vst.msk [vmem:[%s1555_s18 + $0x50] sm:$0xff] %vm706_vm1, %v684_v55  ;;  %654 = vmatmul.bf16.gmra.mxu2 %v514_v56 }
 0x181   : > { %v617_v58 = vpop.f32.mrf.mxu1 }
 0x182   : > { %v685_v62 = vadd.f32 %v1552_v61, %v617_v58 }
 0x184   : > { %718 = vst.msk [vmem:[%s1555_s18 + $0x58] sm:$0xff] %vm706_vm1, %v685_v62 }
 0x189   : > { %v620_v2 = vpop.f32.mrf.mxu1 }
 0x18a   : > { %v686_v3 = vadd.f32 %v1552_v61, %v620_v2 }
 0x18c   : > { %719 = vst.msk [vmem:[%s1555_s18 + $0x60] sm:$0xff] %vm706_vm1, %v686_v3  ;;  %659 = vmatmul.bf16.gmra.mxu2 %v515_v4 }
 0x191   : > { %v622_v6 = vpop.f32.mrf.mxu1 }
 0x192   : > { %v687_v9 = vadd.f32 %v1552_v61, %v622_v6 }
 0x194   : > { %720 = vst.msk [vmem:[%s1555_s18 + $0x68] sm:$0xff] %vm706_vm1, %v687_v9 }
 0x199   : > { %v625_v12 = vpop.f32.mrf.mxu1 }
 0x19a   : > { %v688_v13 = vadd.f32 %v1552_v61, %v625_v12 }
 0x19c   : > { %721 = vst.msk [vmem:[%s1555_s18 + $0x70] sm:$0xff] %vm706_vm1, %v688_v13  ;;  %664 = vmatmul.bf16.gmra.mxu2 %v516_v14 }
 0x1a1   : > { %v627_v15 = vpop.f32.mrf.mxu1 }
 0x1a2   : > { %v689_v16 = vadd.f32 %v1552_v61, %v627_v15 }
 0x1a4   : > { %722 = vst.msk [vmem:[%s1555_s18 + $0x78] sm:$0xff] %vm706_vm1, %v689_v16 }
 0x1af   : > { %v630_v48 = vpop.f32.mrf.mxu2 }
 0x1b0   : > { %v690_v17 = vadd.f32 %v1552_v61, %v630_v48 }
 0x1b2   : > { %723 = vst.msk [vmem:[%s1555_s18 + $0x80] sm:$0xff] %vm706_vm1, %v690_v17 }
 0x1b7   : > { %v632_v18 = vpop.f32.mrf.mxu2 }
 0x1b8   : > { %v691_v19 = vadd.f32 %v1552_v61, %v632_v18 }
 0x1ba   : > { %724 = vst.msk [vmem:[%s1555_s18 + $0x88] sm:$0xff] %vm706_vm1, %v691_v19 }
 0x1bf   : > { %v635_v20 = vpop.f32.mrf.mxu2 }
 0x1c0   : > { %v692_v21 = vadd.f32 %v1552_v61, %v635_v20 }
 0x1c2   : > { %725 = vst.msk [vmem:[%s1555_s18 + $0x90] sm:$0xff] %vm706_vm1, %v692_v21 }
 0x1c7   : > { %v637_v22 = vpop.f32.mrf.mxu2 }
 0x1c8   : > { %v693_v23 = vadd.f32 %v1552_v61, %v637_v22 }
 0x1ca   : > { %726 = vst.msk [vmem:[%s1555_s18 + $0x98] sm:$0xff] %vm706_vm1, %v693_v23 }
 0x1cf   : > { %v640_v24 = vpop.f32.mrf.mxu2 }
 0x1d0   : > { %v694_v25 = vadd.f32 %v1552_v61, %v640_v24 }
 0x1d2   : > { %727 = vst.msk [vmem:[%s1555_s18 + $0xa0] sm:$0xff] %vm706_vm1, %v694_v25 }
 0x1d7   : > { %v642_v26 = vpop.f32.mrf.mxu2 }
 0x1d8   : > { %v695_v27 = vadd.f32 %v1552_v61, %v642_v26 }
 0x1da   : > { %728 = vst.msk [vmem:[%s1555_s18 + $0xa8] sm:$0xff] %vm706_vm1, %v695_v27 }
 0x1df   : > { %v645_v28 = vpop.f32.mrf.mxu2 }
 0x1e0   : > { %v696_v29 = vadd.f32 %v1552_v61, %v645_v28 }
 0x1e2   : > { %729 = vst.msk [vmem:[%s1555_s18 + $0xb0] sm:$0xff] %vm706_vm1, %v696_v29 }
 0x1e7   : > { %v647_v30 = vpop.f32.mrf.mxu2 }
 0x1e8   : > { %v697_v31 = vadd.f32 %v1552_v61, %v647_v30 }
 0x1ea   : > { %730 = vst.msk [vmem:[%s1555_s18 + $0xb8] sm:$0xff] %vm706_vm1, %v697_v31 }
 0x1ef   : > { %v650_v32 = vpop.f32.mrf.mxu2 }
 0x1f0   : > { %v698_v33 = vadd.f32 %v1552_v61, %v650_v32 }
 0x1f2   : > { %731 = vst.msk [vmem:[%s1555_s18 + $0xc0] sm:$0xff] %vm706_vm1, %v698_v33 }
 0x1f7   : > { %v652_v34 = vpop.f32.mrf.mxu2 }
 0x1f8   : > { %v699_v35 = vadd.f32 %v1552_v61, %v652_v34 }
 0x1fa   : > { %732 = vst.msk [vmem:[%s1555_s18 + $0xc8] sm:$0xff] %vm706_vm1, %v699_v35 }
 0x1ff   : > { %v655_v36 = vpop.f32.mrf.mxu2 }
 0x200   : > { %v700_v37 = vadd.f32 %v1552_v61, %v655_v36 }
 0x202   : > { %733 = vst.msk [vmem:[%s1555_s18 + $0xd0] sm:$0xff] %vm706_vm1, %v700_v37 }
 0x207   : > { %v657_v38 = vpop.f32.mrf.mxu2 }
 0x208   : > { %v701_v39 = vadd.f32 %v1552_v61, %v657_v38 }
 0x20a   : > { %734 = vst.msk [vmem:[%s1555_s18 + $0xd8] sm:$0xff] %vm706_vm1, %v701_v39 }
 0x20f   : > { %v660_v40 = vpop.f32.mrf.mxu2 }
 0x210   : > { %v702_v41 = vadd.f32 %v1552_v61, %v660_v40 }
 0x212   : > { %735 = vst.msk [vmem:[%s1555_s18 + $0xe0] sm:$0xff] %vm706_vm1, %v702_v41 }
 0x217   : > { %v662_v42 = vpop.f32.mrf.mxu2 }
 0x218   : > { %v703_v43 = vadd.f32 %v1552_v61, %v662_v42 }
 0x21a   : > { %736 = vst.msk [vmem:[%s1555_s18 + $0xe8] sm:$0xff] %vm706_vm1, %v703_v43 }
 0x21f   : > { %v665_v44 = vpop.f32.mrf.mxu2 }
 0x220   : > { %v704_v45 = vadd.f32 %v1552_v61, %v665_v44 }
 0x222   : > { %737 = vst.msk [vmem:[%s1555_s18 + $0xf0] sm:$0xff] %vm706_vm1, %v704_v45 }
 0x226   : > { %745 = sbr.rel (!%p1427_p4) target bundleno = 619 (0x26b), region = 44 }
 0x227   : > { %v667_v46 = vpop.f32.mrf.mxu2 }
 0x228   : > { %v705_v47 = vadd.f32 %v1552_v61, %v667_v46 }
 0x22a   : > { %738 = vst.msk [vmem:[%s1555_s18 + $0xf8] sm:$0xff] %vm706_vm1, %v705_v47 }
 0x22b   : > { %s1824_s24 = smov (!%p748_p8, %s747_s24), 32 }
 0x22c   : > { %s1152_s7 = sshll.u32 %s1824_s24, 3 }
 0x22d   : > { %p1155_p9 = scmp.eq.s32.totalorder %s1152_s7, 0 }
 0x22e   : > { %s1679_s8 = sshrl.u32 (!%p1155_p9), %s1824_s24, 5 }
 0x22f   : > { %756 = sbr.rel (%p1155_p9) target bundleno = 619 (0x26b), region = 48  ;;  %p1156_p10 = scmp.le.s32.totalorder (!%p1155_p9), %s1679_s8, 0 }
 0x234   : > { %1035 = sbr.rel (%p1156_p10) target bundleno = 602 (0x25a), region = 124  ;;  %s1815_s21 = smov (!%p1156_p10), %s1673_s6 }
 0x235   : > { %s1816_s26 = smov (!%p1156_p10), %s1555_s18  ;;  %s1688_s29 = smov (!%p1156_p10), 0  }
 0x236   : > { %s1690_s9 = smov (!%p1156_p10), 0  }
 0x239 LB: >> { %v881_v61 = vld [vmem:[%s1346_s26] sm:$0xff]  ;;  %v883_v49 = vld [vmem:[%s1346_s26 + $0x8] sm:$0xff]  ;;  %v885_v50 = vld [vmem:[%s1346_s26 + $0x10] sm:$0xff]  ;;  %s945_s10 = sadd.s32 1, %s1350_s29  ;;  %s875_s9 = sadd.s32 1, %s1354_s9   ;;  %s1354_s9 = sphi %s1690_s9, %s875_s9   ;;  %s1350_s29 = sphi %s1688_s29, %s1819_s29   ;;  %s1346_s26 = sphi %s1816_s26, %s1818_s26   ;;  %s1342_s21 = sphi %s1815_s21, %s1817_s21  }
 0x23a   : >> { %882 = vst [vmem:[%s1342_s21] sm:$0xff] %v881_v61  ;;  %v887_v51 = vld [vmem:[%s1346_s26 + $0x18] sm:$0xff]  ;;  %p946_p11 = scmp.ge.s32.totalorder %s945_s10, %s1679_s8  ;;  %v889_v52 = vld [vmem:[%s1346_s26 + $0x20] sm:$0xff]  ;;  %v891_v53 = vld [vmem:[%s1346_s26 + $0x28] sm:$0xff]  ;;  %p874_p12 = scmp.ge.s32.totalorder %s875_s9, %s1679_s8 }
 0x23b   : >> { %884 = vst [vmem:[%s1342_s21 + $0x8] sm:$0xff] %v883_v49  ;;  %v893_v54 = vld [vmem:[%s1346_s26 + $0x30] sm:$0xff]  ;;  %v895_v55 = vld [vmem:[%s1346_s26 + $0x38] sm:$0xff]  ;;  %v897_v56 = vld [vmem:[%s1346_s26 + $0x40] sm:$0xff] }
 0x23c   : >> { %886 = vst [vmem:[%s1342_s21 + $0x10] sm:$0xff] %v885_v50  ;;  %s1826_s10 = smov (%p946_p11, %s945_s10), 0  ;;  %v899_v57 = vld [vmem:[%s1346_s26 + $0x48] sm:$0xff]  ;;  %v901_v58 = vld [vmem:[%s1346_s26 + $0x50] sm:$0xff]  ;;  %v903_v59 = vld [vmem:[%s1346_s26 + $0x58] sm:$0xff] }
 0x23d   : >> { %888 = vst [vmem:[%s1342_s21 + $0x18] sm:$0xff] %v887_v51  ;;  %s1157_s11 = sshll.u32 %s1826_s10, 8  ;;  %v905_v60 = vld [vmem:[%s1346_s26 + $0x60] sm:$0xff]  ;;  %v907_v62 = vld [vmem:[%s1346_s26 + $0x68] sm:$0xff]  ;;  %v909_v63 = vld [vmem:[%s1346_s26 + $0x70] sm:$0xff]  ;;  %s1819_s29 = smov %s1826_s10 }
 0x23e   : >> { %890 = vst [vmem:[%s1342_s21 + $0x20] sm:$0xff] %v889_v52  ;;  %s1722_s12 = scalar_lea.vmem %s1555_s18, %s1157_s11 [#allocation2]   ;;  %s1725_s14 = scalar_lea.vmem %s1673_s6, %s1157_s11   ;;  %v911_v0 = vld [vmem:[%s1346_s26 + $0x78] sm:$0xff]  ;;  %v913_v1 = vld [vmem:[%s1346_s26 + $0x80] sm:$0xff]  ;;  %v915_v2 = vld [vmem:[%s1346_s26 + $0x88] sm:$0xff] }
 0x23f   : >> { %892 = vst [vmem:[%s1342_s21 + $0x28] sm:$0xff] %v891_v53  ;;  %v917_v3 = vld [vmem:[%s1346_s26 + $0x90] sm:$0xff]  ;;  %v919_v4 = vld [vmem:[%s1346_s26 + $0x98] sm:$0xff]  ;;  %v921_v5 = vld [vmem:[%s1346_s26 + $0xa0] sm:$0xff] }
 0x240   : >> { %894 = vst [vmem:[%s1342_s21 + $0x30] sm:$0xff] %v893_v54  ;;  %v923_v6 = vld [vmem:[%s1346_s26 + $0xa8] sm:$0xff]  ;;  %v925_v7 = vld [vmem:[%s1346_s26 + $0xb0] sm:$0xff]  ;;  %v927_v8 = vld [vmem:[%s1346_s26 + $0xb8] sm:$0xff] }
 0x241   : >> { %896 = vst [vmem:[%s1342_s21 + $0x38] sm:$0xff] %v895_v55  ;;  %v929_v9 = vld [vmem:[%s1346_s26 + $0xc0] sm:$0xff]  ;;  %v931_v10 = vld [vmem:[%s1346_s26 + $0xc8] sm:$0xff]  ;;  %v933_v11 = vld [vmem:[%s1346_s26 + $0xd0] sm:$0xff] }
 0x242   : >> { %898 = vst [vmem:[%s1342_s21 + $0x40] sm:$0xff] %v897_v56  ;;  %v935_v12 = vld [vmem:[%s1346_s26 + $0xd8] sm:$0xff]  ;;  %v937_v13 = vld [vmem:[%s1346_s26 + $0xe0] sm:$0xff]  ;;  %v939_v14 = vld [vmem:[%s1346_s26 + $0xe8] sm:$0xff] }
 0x243   : >> { %900 = vst [vmem:[%s1342_s21 + $0x48] sm:$0xff] %v899_v57  ;;  %v941_v15 = vld [vmem:[%s1346_s26 + $0xf0] sm:$0xff]  ;;  %v943_v16 = vld [vmem:[%s1346_s26 + $0xf8] sm:$0xff]  ;;  %s1818_s26 = smov %s1722_s12 }
 0x244   : >> { %902 = vst [vmem:[%s1342_s21 + $0x50] sm:$0xff] %v901_v58 }
 0x245   : >> { %904 = vst [vmem:[%s1342_s21 + $0x58] sm:$0xff] %v903_v59 }
 0x246   : >> { %906 = vst [vmem:[%s1342_s21 + $0x60] sm:$0xff] %v905_v60 }
 0x247   : >> { %908 = vst [vmem:[%s1342_s21 + $0x68] sm:$0xff] %v907_v62 }
 0x248   : >> { %910 = vst [vmem:[%s1342_s21 + $0x70] sm:$0xff] %v909_v63 }
 0x249   : >> { %912 = vst [vmem:[%s1342_s21 + $0x78] sm:$0xff] %v911_v0 }
 0x24a   : >> { %914 = vst [vmem:[%s1342_s21 + $0x80] sm:$0xff] %v913_v1 }
 0x24b   : >> { %916 = vst [vmem:[%s1342_s21 + $0x88] sm:$0xff] %v915_v2 }
 0x24c   : >> { %918 = vst [vmem:[%s1342_s21 + $0x90] sm:$0xff] %v917_v3 }
 0x24d   : >> { %920 = vst [vmem:[%s1342_s21 + $0x98] sm:$0xff] %v919_v4 }
 0x24e   : >> { %922 = vst [vmem:[%s1342_s21 + $0xa0] sm:$0xff] %v921_v5 }
 0x24f   : >> { %924 = vst [vmem:[%s1342_s21 + $0xa8] sm:$0xff] %v923_v6 }
 0x250   : >> { %926 = vst [vmem:[%s1342_s21 + $0xb0] sm:$0xff] %v925_v7 }
 0x251   : >> { %928 = vst [vmem:[%s1342_s21 + $0xb8] sm:$0xff] %v927_v8 }
 0x252   : >> { %930 = vst [vmem:[%s1342_s21 + $0xc0] sm:$0xff] %v929_v9 }
 0x253   : >> { %932 = vst [vmem:[%s1342_s21 + $0xc8] sm:$0xff] %v931_v10 }
 0x254   : >> { %934 = vst [vmem:[%s1342_s21 + $0xd0] sm:$0xff] %v933_v11 }
 0x255   : >> { %936 = vst [vmem:[%s1342_s21 + $0xd8] sm:$0xff] %v935_v12  ;;  %877 = sbr.rel (!%p874_p12) target bundleno = 569 (0x239), region = 130 }
 0x256   : >> { %938 = vst [vmem:[%s1342_s21 + $0xe0] sm:$0xff] %v937_v13 }
 0x257   : >> { %940 = vst [vmem:[%s1342_s21 + $0xe8] sm:$0xff] %v939_v14 }
 0x258   : >> { %942 = vst [vmem:[%s1342_s21 + $0xf0] sm:$0xff] %v941_v15 }
 0x259   : >> { %944 = vst [vmem:[%s1342_s21 + $0xf8] sm:$0xff] %v943_v16  ;;  %s1817_s21 = smov %s1725_s14 }
 0x25a PF: > { %s1790_s15 = sand.u32 31, %s1824_s24   ;;  %s1180_s16 = sshll.u32 %s1679_s8, 8 }
 0x25b   : > { %s956_s13 = scalar_lea.vmem %s1555_s18, %s1180_s16 [#allocation2]   ;;  %s958_s17 = scalar_lea.vmem %s1673_s6, %s1180_s16  }
 0x25c   : > { %p1162_p13 = scmp.le.s32.totalorder %s1790_s15, 0 }
 0x25d   : > { %s1356_s20 = smov (!%p1162_p13), %s958_s17   ;;  %s1360_s23 = smov (!%p1162_p13), %s956_s13  }
 0x25e   : > { %1049 = sbr.rel (%p1162_p13) target bundleno = 619 (0x26b), region = 135  ;;  %s1364_s27 = smov (!%p1162_p13), 0  }
 0x25f   : > { %s1368_s28 = smov (!%p1162_p13), 0  }
 0x263 LB: >> { %v968_v48 = vld [vmem:[%s1362_s23] sm:$0xff]  ;;  %s970_s24 = sadd.s32 1, %s1366_s27  ;;  %s962_s28 = sadd.s32 1, %s1370_s28   ;;  %s1370_s28 = sphi %s1368_s28, %s962_s28   ;;  %s1366_s27 = sphi %s1364_s27, %s1365_s27   ;;  %s1362_s23 = sphi %s1360_s23, %s975_s23   ;;  %s1358_s20 = sphi %s1356_s20, %s976_s20  }
 0x264   : >> { %969 = vst [vmem:[%s1358_s20] sm:$0xff] %v968_v48  ;;  %p971_p0 = scmp.ge.s32.totalorder %s970_s24, %s1790_s15  ;;  %p961_p1 = scmp.ge.s32.totalorder %s962_s28, %s1790_s15 }
 0x266   : >> { %s1828_s24 = smov (%p971_p0, %s970_s24), 0  ;;  %964 = sbr.rel (!%p961_p1) target bundleno = 611 (0x263), region = 141 }
 0x267   : >> { %s1163_s18 = sshll.u32 %s1828_s24, 3  ;;  %s1365_s27 = smov %s1828_s24  }
 0x268   : >> { %s975_s23 = scalar_lea.vmem %s956_s13, %s1163_s18 [#allocation2]   ;;  %s976_s20 = scalar_lea.vmem %s958_s17, %s1163_s18  }
 0x26b PF: > { %p12_p2 = scmp.ge.s32.totalorder %s1417_s22, 4   ;;  %s1820_s18 = smov %s1334_s19 }
 0x26c   : > { %s1821_s19 = smov %s1425_s25  ;;  %s1822_s20 = smov %s1417_s22 }
 0x26d   :  { %14 = sbr.rel (!%p12_p2) target bundleno = 2 (0x2), region = 152 }

// kernel: tpu_custom_call.1
= control target key start
LH: loop header
LB: loop body
LE: loop exit
PB: predicated region body
PF: predicated region fallthrough
CT: control target
= control target key end

     0   :  { %s1402_s18 = smov 0   ;;  %s1404_s19 = smov 0   ;;  %s1808_s0 = inlined_call_operand.vmem [shape: f32[500,64], index: 0, kind: input, shape index: {}]   ;;  %s1809_s1 = inlined_call_operand.vmem [shape: bf16[64,128], index: 1, kind: input, shape index: {}]   ;;  %s1810_s2 = inlined_call_operand.vmem [shape: f32[1,128], index: 2, kind: input, shape index: {}]   ;;  %s1811_s3 = inlined_call_operand.vmem [shape: bf16[128,128], index: 3, kind: input, shape index: {}]   ;;  %s1812_s4 = inlined_call_operand.vmem [shape: f32[1,2], index: 4, kind: input, shape index: {}]   ;;  %s1813_s5 = inlined_call_operand.vmem [shape: f32[500,2], index: 5, kind: output, shape index: {}]  }
   0x1   :  { %s1406_s20 = smov 0  }
   0x2 LB: > { %s1415_s21 = sadd.s32 4294967295, %s1338_s20   ;;  %s1417_s22 = sadd.s32 1, %s1338_s20   ;;  %s1338_s20 = sphi %s1406_s20, %s1822_s20   ;;  %s1334_s19 = sphi %s1404_s19, %s1821_s19   ;;  %s1330_s18 = sphi %s1402_s18, %s1820_s18  }
   0x3   : > { %s129_s23 = ssub.s32 %s1338_s20, %s1417_s22  ;;  %s132_s24 = sadd.s32 1, %s1334_s19 }
   0x4   : > { %p130_p0 = scmp.eq.s32.totalorder %s129_s23, 0  ;;  %p142_p1 = scmp.ne.s32.totalorder %s1334_s19, %s1330_s18 }
   0x5   : > { %p143_p2 = scmp.eq.s32.totalorder %s1415_s21, 1  ;;  %p1082_p3 = scmp.ge.s32.totalorder %s1338_s20, 1 }
   0x6   : > { %s1425_s25 = scalar_select %p130_p0, %s1334_s19, %s132_s24  }
   0x7   : > { %p1427_p4 = por %p143_p2, %p142_p1  ;;  %p196_p5 = scmp.lt.s32.totalorder %s1338_s20, 3 }
   0x9   : > { %p197_p6 = pnand %p1082_p3, %p196_p5 }
   0xa   : > { %s1435_s29 = sshll.u32 (!%p197_p6), %s1415_s21, 5 }
   0xb   : > { %200 = sbr.rel (%p197_p6) target bundleno = 619 (0x26b), region = 40  ;;  %p232_p7 = scmp.lt.s32.totalorder (!%p197_p6), %s1435_s29, 62 }
  0x10   : > { %v1170_v0 = vld [vmem:[%s1809_s1 + $0x18] sm:$0xff]  ;;  %v1169_v1 = vld [vmem:[%s1809_s1 + $0x10] sm:$0xff]  ;;  %s233_s7 = scalar_select %p232_p7, %s1435_s29, 62  ;;  %v1168_v2 = vld [vmem:[%s1809_s1 + $0x8] sm:$0xff]  ;;  %vm331_vm0 = vcmask 523264   ;;  %vm706_vm1 = vcmask 15360  }
  0x11   : > { %384 = vmatpush.bf16.msra.mxu0 %v1170_v0  ;;  %1182 = vmatpush.bf16.msra.mxu3 %v1170_v0  ;;  %v1167_v3 = vld [vmem:[%s1809_s1] sm:$0xff]  ;;  %v1178_v19 = vld [vmem:[%s1811_s3 + $0x38] sm:$0xff]  ;;  %v1177_v23 = vld [vmem:[%s1811_s3 + $0x30] sm:$0xff]  ;;  %s747_s24 = ssub.s32 (%p1427_p4), 63, %s1435_s29  ;;  %s1179_s27 = sshll.u32 (%p1427_p4), %s1415_s21, 8 }
  0x12   : > { %s1085_s8 = sshll.u32 %s233_s7, 3  ;;  %581 = vmatpush.bf16.msra.mxu1 %v1178_v19  ;;  %1186 = vmatpush.bf16.msra.mxu2 %v1178_v19  ;;  %v1176_v24 = vld [vmem:[%s1811_s3 + $0x28] sm:$0xff]  ;;  %v1175_v25 = vld [vmem:[%s1811_s3 + $0x20] sm:$0xff]  ;;  %v1174_v28 = vld [vmem:[%s1811_s3 + $0x18] sm:$0xff]  ;;  %p748_p8 = scmp.lt.s32.totalorder (%p1427_p4), %s747_s24, 32 }
  0x13   : > { %s1448_s13 = scalar_lea.vmem %s1808_s0, %s1085_s8  ;;  %v1173_v30 = vld [vmem:[%s1811_s3 + $0x10] sm:$0xff]  ;;  %v1172_v34 = vld [vmem:[%s1811_s3 + $0x8] sm:$0xff]  ;;  %v1171_v35 = vld [vmem:[%s1811_s3] sm:$0xff]  ;;  %s1673_s6 = scalar_lea.vmem (%p1427_p4), %s1813_s5, %s1179_s27  }
  0x14   : > { %v247_v4 = vld [vmem:[%s1448_s13] sm:$0xff]  ;;  %v248_v5 = vld [vmem:[%s1448_s13 + $0x8] sm:$0xff]  ;;  %v249_v7 = vld [vmem:[%s1448_s13 + $0x10] sm:$0xff] }
  0x15   : > { %385 = vmatpush.bf16.msra.mxu0 %v1169_v1  ;;  %1183 = vmatpush.bf16.msra.mxu3 %v1169_v1  ;;  %v279_v6 = vpack.c.bf16 %v248_v5, %v247_v4  ;;  %v250_v8 = vld [vmem:[%s1448_s13 + $0x18] sm:$0xff]  ;;  %v251_v10 = vld [vmem:[%s1448_s13 + $0x20] sm:$0xff]  ;;  %v252_v11 = vld [vmem:[%s1448_s13 + $0x28] sm:$0xff] }
  0x16   : > { %v280_v9 = vpack.c.bf16 %v250_v8, %v249_v7  ;;  %v281_v12 = vpack.c.bf16 %v252_v11, %v251_v10  ;;  %v253_v13 = vld [vmem:[%s1448_s13 + $0x30] sm:$0xff]  ;;  %v254_v14 = vld [vmem:[%s1448_s13 + $0x38] sm:$0xff]  ;;  %v255_v16 = vld [vmem:[%s1448_s13 + $0x40] sm:$0xff]  ;;  %582 = vmatpush.bf16.msra.mxu1 %v1177_v23  ;;  %1187 = vmatpush.bf16.msra.mxu2 %v1177_v23 }
  0x17   : > { %v282_v15 = vpack.c.bf16 %v254_v14, %v253_v13  ;;  %v256_v17 = vld [vmem:[%s1448_s13 + $0x48] sm:$0xff]  ;;  %v257_v20 = vld [vmem:[%s1448_s13 + $0x50] sm:$0xff]  ;;  %v258_v21 = vld [vmem:[%s1448_s13 + $0x58] sm:$0xff] }
  0x18   : > { %v283_v18 = vpack.c.bf16 %v256_v17, %v255_v16  ;;  %v284_v22 = vpack.c.bf16 %v258_v21, %v257_v20  ;;  %v259_v26 = vld [vmem:[%s1448_s13 + $0x60] sm:$0xff]  ;;  %v260_v27 = vld [vmem:[%s1448_s13 + $0x68] sm:$0xff]  ;;  %v265_v31 = vld [vmem:[%s1448_s13 + $0x90] sm:$0xff] }
  0x19   : > { %386 = vmatpush.bf16.msra.mxu0 %v1168_v2  ;;  %1184 = vmatpush.bf16.msra.mxu3 %v1168_v2  ;;  %v285_v29 = vpack.c.bf16 %v260_v27, %v259_v26  ;;  %v266_v32 = vld [vmem:[%s1448_s13 + $0x98] sm:$0xff]  ;;  %v261_v36 = vld [vmem:[%s1448_s13 + $0x70] sm:$0xff]  ;;  %v267_v39 = vld [vmem:[%s1448_s13 + $0xa0] sm:$0xff] }
  0x1a   : > { %583 = vmatpush.bf16.msra.mxu1 %v1176_v24  ;;  %1188 = vmatpush.bf16.msra.mxu2 %v1176_v24  ;;  %v288_v33 = vpack.c.bf16 %v266_v32, %v265_v31  ;;  %v262_v37 = vld [vmem:[%s1448_s13 + $0x78] sm:$0xff]  ;;  %v268_v40 = vld [vmem:[%s1448_s13 + $0xa8] sm:$0xff]  ;;  %v263_v42 = vld [vmem:[%s1448_s13 + $0x80] sm:$0xff] }
  0x1b   : > { %v286_v38 = vpack.c.bf16 %v262_v37, %v261_v36  ;;  %v289_v41 = vpack.c.bf16 %v268_v40, %v267_v39  ;;  %v264_v43 = vld [vmem:[%s1448_s13 + $0x88] sm:$0xff]  ;;  %v269_v46 = vld [vmem:[%s1448_s13 + $0xb0] sm:$0xff]  ;;  %v270_v47 = vld [vmem:[%s1448_s13 + $0xb8] sm:$0xff] }
  0x1c   : > { %v287_v44 = vpack.c.bf16 %v264_v43, %v263_v42  ;;  %v1514_v48 = vld [vmem:[%s1810_s2] ss:$0 sm:$0xff]  ;;  %v290_v49 = vpack.c.bf16 %v270_v47, %v269_v46  ;;  %v272_v58 = vld [vmem:[%s1448_s13 + $0xc8] sm:$0xff]  ;;  %v274_v4 = vld [vmem:[%s1448_s13 + $0xd8] sm:$0xff] }
  0x1d   : > { %387 = vmatpush.bf16.msra.mxu0 %v1167_v3  ;;  %1185 = vmatpush.bf16.msra.mxu3 %v1167_v3  ;;  %v271_v57 = vld [vmem:[%s1448_s13 + $0xc0] sm:$0xff]  ;;  %v273_v3 = vld [vmem:[%s1448_s13 + $0xd0] sm:$0xff]  ;;  %v276_v14 = vld [vmem:[%s1448_s13 + $0xe8] sm:$0xff] }
  0x1e   : > { %584 = vmatpush.bf16.msra.mxu1 %v1175_v25  ;;  %1189 = vmatpush.bf16.msra.mxu2 %v1175_v25  ;;  %v291_v59 = vpack.c.bf16 %v272_v58, %v271_v57  ;;  %v292_v5 = vpack.c.bf16 %v274_v4, %v273_v3  ;;  %v275_v13 = vld [vmem:[%s1448_s13 + $0xe0] sm:$0xff]  ;;  %v277_v23 = vld [vmem:[%s1448_s13 + $0xf0] sm:$0xff]  ;;  %v278_v24 = vld [vmem:[%s1448_s13 + $0xf8] sm:$0xff]  ;;  %s224_s13 = sand.u32 1, %s1330_s18  }
  0x1f   : > { %v294_v25 = vpack.c.bf16 %v278_v24, %v277_v23  ;;  %s1083_s17 = sshll.u32 %s224_s13, 8 }
  0x20   : > { %1102 = vmatmul.msk.bf16.vlgmr.msra.gmra.mxu0 %vm331_vm0, %v279_v6  ;;  %1111 = vmatmul.msk.bf16.vlgmr.msra.gmra.mxu3 %vm331_vm0, %v288_v33  ;;  %s1555_s18 = scalar_lea.vmem [#allocation2], %s1083_s17  }
  0x22   : > { %585 = vmatpush.bf16.msra.mxu1 %v1174_v28  ;;  %1190 = vmatpush.bf16.msra.mxu2 %v1174_v28 }
  0x26   : > { %586 = vmatpush.bf16.msra.mxu1 %v1173_v30  ;;  %1191 = vmatpush.bf16.msra.mxu2 %v1173_v30 }
  0x2a   : > { %587 = vmatpush.bf16.msra.mxu1 %v1172_v34  ;;  %1192 = vmatpush.bf16.msra.mxu2 %v1172_v34 }
  0x2e   : > { %588 = vmatpush.bf16.msra.mxu1 %v1171_v35  ;;  %1193 = vmatpush.bf16.msra.mxu2 %v1171_v35 }
  0x30   : > { %1103 = vmatmul.msk.bf16.gmra.mxu0 %vm331_vm0, %v280_v9  ;;  %1112 = vmatmul.msk.bf16.gmra.mxu3 %vm331_vm0, %v289_v41 }
  0x40   : > { %1104 = vmatmul.msk.bf16.gmra.mxu0 %vm331_vm0, %v281_v12  ;;  %1113 = vmatmul.msk.bf16.gmra.mxu3 %vm331_vm0, %v290_v49 }
  0x50   : > { %1105 = vmatmul.msk.bf16.gmra.mxu0 %vm331_vm0, %v282_v15  ;;  %1114 = vmatmul.msk.bf16.gmra.mxu3 %vm331_vm0, %v291_v59  ;;  %v293_v15 = vpack.c.bf16 %v276_v14, %v275_v13 }
  0x60   : > { %1106 = vmatmul.msk.bf16.gmra.mxu0 %vm331_vm0, %v283_v18  ;;  %1115 = vmatmul.msk.bf16.gmra.mxu3 %vm331_vm0, %v292_v5 }
  0x70   : > { %1107 = vmatmul.msk.bf16.gmra.mxu0 %vm331_vm0, %v284_v22  ;;  %1116 = vmatmul.msk.bf16.gmra.mxu3 %vm331_vm0, %v293_v15 }
  0x80   : > { %1108 = vmatmul.msk.bf16.gmra.mxu0 %vm331_vm0, %v285_v29  ;;  %1117 = vmatmul.msk.bf16.gmra.mxu3 %vm331_vm0, %v294_v25 }
  0x90   : > { %1109 = vmatmul.msk.bf16.gmra.mxu0 %vm331_vm0, %v286_v38 }
  0x9d   : > { %v389_v45 = vpop.f32.mrf.mxu0 }
  0x9e   : > { %v390_v50 = vadd.f32 %v1514_v48, %v389_v45 }
  0xa0   : > { %1110 = vmatmul.msk.bf16.gmra.mxu0 %vm331_vm0, %v287_v44  ;;  %v469_v53 = vmax.f32 %v390_v50, 0.0 }
  0xa3   : > { %v434_v47 = vpop.f32.mrf.mxu3 }
  0xa4   : > { %v435_v5 = vadd.f32 %v1514_v48, %v434_v47 }
  0xa5   : > { %v391_v51 = vpop.f32.mrf.mxu0 }
  0xa6   : > { %v392_v52 = vadd.f32 %v1514_v48, %v391_v51 }
  0xa8   : > { %v470_v54 = vmax.f32 %v392_v52, 0.0 }
  0xaa   : > { %v501_v55 = vpack.c.bf16 %v470_v54, %v469_v53 }
  0xab   : > { %v436_v52 = vpop.f32.mrf.mxu3 }
  0xac   : > { %589 = vmatmul.bf16.vlgmr.msra.gmra.mxu1 %v501_v55 }
  0xad   : > { %v394_v56 = vpop.f32.mrf.mxu0 }
  0xae   : > { %v395_v60 = vadd.f32 %v1514_v48, %v394_v56 }
  0xb0   : > { %v471_v63 = vmax.f32 %v395_v60, 0.0 }
  0xb3   : > { %v439_v57 = vpop.f32.mrf.mxu3 }
  0xb5   : > { %v396_v61 = vpop.f32.mrf.mxu0 }
  0xb6   : > { %v397_v62 = vadd.f32 %v1514_v48, %v396_v61  ;;  %v1552_v61 = vld [vmem:[%s1812_s4] ss:$0 sm:$0xff] }
  0xb8   : > { %v472_v0 = vmax.f32 %v397_v62, 0.0 }
  0xba   : > { %v502_v1 = vpack.c.bf16 %v472_v0, %v471_v63 }
  0xbb   : > { %v441_v3 = vpop.f32.mrf.mxu3 }
  0xbc   : > { %594 = vmatmul.bf16.gmra.mxu1 %v502_v1 }
  0xbd   : > { %v399_v2 = vpop.f32.mrf.mxu0 }
  0xbe   : > { %v400_v6 = vadd.f32 %v1514_v48, %v399_v2 }
  0xc0   : > { %v473_v9 = vmax.f32 %v400_v6, 0.0  ;;  %v437_v6 = vadd.f32 %v1514_v48, %v436_v52 }
  0xc5   : > { %v401_v7 = vpop.f32.mrf.mxu0 }
  0xc6   : > { %v402_v8 = vadd.f32 %v1514_v48, %v401_v7 }
  0xc8   : > { %v474_v10 = vmax.f32 %v402_v8, 0.0  ;;  %v444_v8 = vpop.f32.mrf.mxu3 }
  0xca   : > { %v503_v11 = vpack.c.bf16 %v474_v10, %v473_v9  ;;  %v487_v9 = vmax.f32 %v435_v5, 0.0  ;;  %v488_v10 = vmax.f32 %v437_v6, 0.0 }
  0xcc   : > { %599 = vmatmul.bf16.gmra.mxu1 %v503_v11  ;;  %v510_v13 = vpack.c.bf16 %v488_v10, %v487_v9 }
  0xcd   : > { %v404_v12 = vpop.f32.mrf.mxu0 }
  0xce   : > { %v405_v16 = vadd.f32 %v1514_v48, %v404_v12 }
  0xd0   : > { %v475_v19 = vmax.f32 %v405_v16, 0.0  ;;  %v446_v14 = vpop.f32.mrf.mxu3  ;;  %v440_v16 = vadd.f32 %v1514_v48, %v439_v57 }
  0xd5   : > { %v406_v17 = vpop.f32.mrf.mxu0 }
  0xd6   : > { %v407_v18 = vadd.f32 %v1514_v48, %v406_v17  ;;  %v442_v17 = vadd.f32 %v1514_v48, %v441_v3 }
  0xd8   : > { %v476_v20 = vmax.f32 %v407_v18, 0.0 }
  0xda   : > { %v504_v21 = vpack.c.bf16 %v476_v20, %v475_v19  ;;  %v489_v19 = vmax.f32 %v440_v16, 0.0  ;;  %v490_v20 = vmax.f32 %v442_v17, 0.0 }
  0xdc   : > { %604 = vmatmul.bf16.gmra.mxu1 %v504_v21  ;;  %v511_v24 = vpack.c.bf16 %v490_v20, %v489_v19 }
  0xdd   : > { %v409_v22 = vpop.f32.mrf.mxu0 }
  0xde   : > { %v410_v26 = vadd.f32 %v1514_v48, %v409_v22  ;;  %v449_v22 = vpop.f32.mrf.mxu3 }
  0xe0   : > { %v477_v29 = vmax.f32 %v410_v26, 0.0  ;;  %v445_v26 = vadd.f32 %v1514_v48, %v444_v8 }
  0xe5   : > { %v411_v27 = vpop.f32.mrf.mxu0 }
  0xe6   : > { %v412_v28 = vadd.f32 %v1514_v48, %v411_v27  ;;  %v447_v27 = vadd.f32 %v1514_v48, %v446_v14 }
  0xe8   : > { %v478_v30 = vmax.f32 %v412_v28, 0.0 }
  0xea   : > { %v505_v31 = vpack.c.bf16 %v478_v30, %v477_v29  ;;  %v451_v29 = vpop.f32.mrf.mxu3  ;;  %v491_v30 = vmax.f32 %v445_v26, 0.0 }
  0xec   : > { %609 = vmatmul.bf16.gmra.mxu1 %v505_v31  ;;  %v492_v31 = vmax.f32 %v447_v27, 0.0 }
  0xed   : > { %v414_v32 = vpop.f32.mrf.mxu0 }
  0xee   : > { %v415_v33 = vadd.f32 %v1514_v48, %v414_v32 }
  0xf0   : > { %v479_v36 = vmax.f32 %v415_v33, 0.0 }
  0xf5   : > { %v416_v34 = vpop.f32.mrf.mxu0 }
  0xf6   : > { %v417_v35 = vadd.f32 %v1514_v48, %v416_v34  ;;  %v512_v34 = vpack.c.bf16 %v492_v31, %v491_v30 }
  0xf8   : > { %v480_v37 = vmax.f32 %v417_v35, 0.0  ;;  %v454_v35 = vpop.f32.mrf.mxu3 }
  0xfa   : > { %v506_v38 = vpack.c.bf16 %v480_v37, %v479_v36  ;;  %v450_v37 = vadd.f32 %v1514_v48, %v449_v22 }
  0xfc   : > { %614 = vmatmul.bf16.gmra.mxu1 %v506_v38  ;;  %v452_v38 = vadd.f32 %v1514_v48, %v451_v29 }
  0xfd   : > { %v419_v39 = vpop.f32.mrf.mxu0 }
  0xfe   : > { %v420_v40 = vadd.f32 %v1514_v48, %v419_v39 }
 0x100   : > { %v481_v43 = vmax.f32 %v420_v40, 0.0  ;;  %v493_v40 = vmax.f32 %v450_v37, 0.0 }
 0x105   : > { %v421_v41 = vpop.f32.mrf.mxu0 }
 0x106   : > { %v422_v42 = vadd.f32 %v1514_v48, %v421_v41  ;;  %v494_v41 = vmax.f32 %v452_v38, 0.0 }
 0x108   : > { %v482_v44 = vmax.f32 %v422_v42, 0.0  ;;  %v456_v42 = vpop.f32.mrf.mxu3 }
 0x10a   : > { %v507_v45 = vpack.c.bf16 %v482_v44, %v481_v43 }
 0x10c   : > { %619 = vmatmul.bf16.gmra.mxu1 %v507_v45  ;;  %v513_v45 = vpack.c.bf16 %v494_v41, %v493_v40 }
 0x10d   : > { %v424_v46 = vpop.f32.mrf.mxu0 }
 0x10e   : > { %v425_v49 = vadd.f32 %v1514_v48, %v424_v46 }
 0x110   : > { %v483_v53 = vmax.f32 %v425_v49, 0.0  ;;  %v459_v47 = vpop.f32.mrf.mxu3  ;;  %v455_v49 = vadd.f32 %v1514_v48, %v454_v35 }
 0x112   : > { %v495_v52 = vmax.f32 %v455_v49, 0.0 }
 0x115   : > { %v426_v50 = vpop.f32.mrf.mxu0 }
 0x116   : > { %v427_v51 = vadd.f32 %v1514_v48, %v426_v50  ;;  %v457_v50 = vadd.f32 %v1514_v48, %v456_v42 }
 0x118   : > { %v484_v54 = vmax.f32 %v427_v51, 0.0  ;;  %v461_v57 = vpop.f32.mrf.mxu3 }
 0x11a   : > { %v508_v55 = vpack.c.bf16 %v484_v54, %v483_v53  ;;  %v496_v53 = vmax.f32 %v457_v50, 0.0 }
 0x11c   : > { %624 = vmatmul.bf16.gmra.mxu1 %v508_v55 }
 0x11d   : > { %v429_v56 = vpop.f32.mrf.mxu0 }
 0x11e   : > { %v430_v58 = vadd.f32 %v1514_v48, %v429_v56  ;;  %v514_v56 = vpack.c.bf16 %v496_v53, %v495_v52 }
 0x120   : > { %v485_v62 = vmax.f32 %v430_v58, 0.0 }
 0x125   : > { %v431_v59 = vpop.f32.mrf.mxu0 }
 0x126   : > { %v432_v60 = vadd.f32 %v1514_v48, %v431_v59  ;;  %v460_v59 = vadd.f32 %v1514_v48, %v459_v47 }
 0x128   : > { %v486_v63 = vmax.f32 %v432_v60, 0.0  ;;  %v462_v60 = vadd.f32 %v1514_v48, %v461_v57 }
 0x129   : > { %v590_v0 = vpop.f32.mrf.mxu1 }
 0x12a   : > { %v674_v1 = vadd.f32 %v1552_v61, %v590_v0  ;;  %v509_v2 = vpack.c.bf16 %v486_v63, %v485_v62  ;;  %v464_v63 = vpop.f32.mrf.mxu3  ;;  %v497_v0 = vmax.f32 %v460_v59, 0.0 }
 0x12c   : > { %707 = vst.msk [vmem:[%s1555_s18] sm:$0xff] %vm706_vm1, %v674_v1  ;;  %629 = vmatmul.bf16.vlgmr.msra.gmra.mxu2 %v509_v2  ;;  %v498_v1 = vmax.f32 %v462_v60, 0.0 }
 0x131   : > { %v592_v4 = vpop.f32.mrf.mxu1 }
 0x132   : > { %v675_v7 = vadd.f32 %v1552_v61, %v592_v4  ;;  %v515_v4 = vpack.c.bf16 %v498_v1, %v497_v0  ;;  %v466_v5 = vpop.f32.mrf.mxu3 }
 0x133   : > { %v467_v8 = vadd.f32 %v1514_v48, %v466_v5 }
 0x134   : > { %708 = vst.msk [vmem:[%s1555_s18 + $0x8] sm:$0xff] %vm706_vm1, %v675_v7  ;;  %v465_v7 = vadd.f32 %v1514_v48, %v464_v63 }
 0x136   : > { %v499_v10 = vmax.f32 %v465_v7, 0.0 }
 0x139   : > { %v595_v11 = vpop.f32.mrf.mxu1 }
 0x13a   : > { %v676_v12 = vadd.f32 %v1552_v61, %v595_v11  ;;  %v500_v11 = vmax.f32 %v467_v8, 0.0 }
 0x13c   : > { %709 = vst.msk [vmem:[%s1555_s18 + $0x10] sm:$0xff] %vm706_vm1, %v676_v12  ;;  %634 = vmatmul.bf16.gmra.mxu2 %v510_v13  ;;  %v516_v14 = vpack.c.bf16 %v500_v11, %v499_v10 }
 0x141   : > { %v597_v15 = vpop.f32.mrf.mxu1 }
 0x142   : > { %v677_v18 = vadd.f32 %v1552_v61, %v597_v15 }
 0x144   : > { %710 = vst.msk [vmem:[%s1555_s18 + $0x18] sm:$0xff] %vm706_vm1, %v677_v18 }
 0x149   : > { %v600_v21 = vpop.f32.mrf.mxu1 }
 0x14a   : > { %v678_v23 = vadd.f32 %v1552_v61, %v600_v21 }
 0x14c   : > { %711 = vst.msk [vmem:[%s1555_s18 + $0x20] sm:$0xff] %vm706_vm1, %v678_v23  ;;  %639 = vmatmul.bf16.gmra.mxu2 %v511_v24 }
 0x151   : > { %v602_v25 = vpop.f32.mrf.mxu1 }
 0x152   : > { %v679_v28 = vadd.f32 %v1552_v61, %v602_v25 }
 0x154   : > { %712 = vst.msk [vmem:[%s1555_s18 + $0x28] sm:$0xff] %vm706_vm1, %v679_v28 }
 0x159   : > { %v605_v32 = vpop.f32.mrf.mxu1 }
 0x15a   : > { %v680_v33 = vadd.f32 %v1552_v61, %v605_v32 }
 0x15c   : > { %713 = vst.msk [vmem:[%s1555_s18 + $0x30] sm:$0xff] %vm706_vm1, %v680_v33  ;;  %644 = vmatmul.bf16.gmra.mxu2 %v512_v34 }
 0x161   : > { %v607_v36 = vpop.f32.mrf.mxu1 }
 0x162   : > { %v681_v39 = vadd.f32 %v1552_v61, %v607_v36 }
 0x164   : > { %714 = vst.msk [vmem:[%s1555_s18 + $0x38] sm:$0xff] %vm706_vm1, %v681_v39 }
 0x169   : > { %v610_v43 = vpop.f32.mrf.mxu1 }
 0x16a   : > { %v682_v44 = vadd.f32 %v1552_v61, %v610_v43 }
 0x16c   : > { %715 = vst.msk [vmem:[%s1555_s18 + $0x40] sm:$0xff] %vm706_vm1, %v682_v44  ;;  %649 = vmatmul.bf16.gmra.mxu2 %v513_v45 }
 0x171   : > { %v612_v46 = vpop.f32.mrf.mxu1 }
 0x172   : > { %v683_v51 = vadd.f32 %v1552_v61, %v612_v46 }
 0x174   : > { %716 = vst.msk [vmem:[%s1555_s18 + $0x48] sm:$0xff] %vm706_vm1, %v683_v51 }
 0x179   : > { %v615_v54 = vpop.f32.mrf.mxu1 }
 0x17a   : > { %v684_v55 = vadd.f32 %v1552_v61, %v615_v54 }
 0x17c   : > { %717 = vst.msk [vmem:[%s1555_s18 + $0x50] sm:$0xff] %vm706_vm1, %v684_v55  ;;  %654 = vmatmul.bf16.gmra.mxu2 %v514_v56 }
 0x181   : > { %v617_v58 = vpop.f32.mrf.mxu1 }
 0x182   : > { %v685_v62 = vadd.f32 %v1552_v61, %v617_v58 }
 0x184   : > { %718 = vst.msk [vmem:[%s1555_s18 + $0x58] sm:$0xff] %vm706_vm1, %v685_v62 }
 0x189   : > { %v620_v2 = vpop.f32.mrf.mxu1 }
 0x18a   : > { %v686_v3 = vadd.f32 %v1552_v61, %v620_v2 }
 0x18c   : > { %719 = vst.msk [vmem:[%s1555_s18 + $0x60] sm:$0xff] %vm706_vm1, %v686_v3  ;;  %659 = vmatmul.bf16.gmra.mxu2 %v515_v4 }
 0x191   : > { %v622_v6 = vpop.f32.mrf.mxu1 }
 0x192   : > { %v687_v9 = vadd.f32 %v1552_v61, %v622_v6 }
 0x194   : > { %720 = vst.msk [vmem:[%s1555_s18 + $0x68] sm:$0xff] %vm706_vm1, %v687_v9 }
 0x199   : > { %v625_v12 = vpop.f32.mrf.mxu1 }
 0x19a   : > { %v688_v13 = vadd.f32 %v1552_v61, %v625_v12 }
 0x19c   : > { %721 = vst.msk [vmem:[%s1555_s18 + $0x70] sm:$0xff] %vm706_vm1, %v688_v13  ;;  %664 = vmatmul.bf16.gmra.mxu2 %v516_v14 }
 0x1a1   : > { %v627_v15 = vpop.f32.mrf.mxu1 }
 0x1a2   : > { %v689_v16 = vadd.f32 %v1552_v61, %v627_v15 }
 0x1a4   : > { %722 = vst.msk [vmem:[%s1555_s18 + $0x78] sm:$0xff] %vm706_vm1, %v689_v16 }
 0x1af   : > { %v630_v48 = vpop.f32.mrf.mxu2 }
 0x1b0   : > { %v690_v17 = vadd.f32 %v1552_v61, %v630_v48 }
 0x1b2   : > { %723 = vst.msk [vmem:[%s1555_s18 + $0x80] sm:$0xff] %vm706_vm1, %v690_v17 }
 0x1b7   : > { %v632_v18 = vpop.f32.mrf.mxu2 }
 0x1b8   : > { %v691_v19 = vadd.f32 %v1552_v61, %v632_v18 }
 0x1ba   : > { %724 = vst.msk [vmem:[%s1555_s18 + $0x88] sm:$0xff] %vm706_vm1, %v691_v19 }
 0x1bf   : > { %v635_v20 = vpop.f32.mrf.mxu2 }
 0x1c0   : > { %v692_v21 = vadd.f32 %v1552_v61, %v635_v20 }
 0x1c2   : > { %725 = vst.msk [vmem:[%s1555_s18 + $0x90] sm:$0xff] %vm706_vm1, %v692_v21 }
 0x1c7   : > { %v637_v22 = vpop.f32.mrf.mxu2 }
 0x1c8   : > { %v693_v23 = vadd.f32 %v1552_v61, %v637_v22 }
 0x1ca   : > { %726 = vst.msk [vmem:[%s1555_s18 + $0x98] sm:$0xff] %vm706_vm1, %v693_v23 }
 0x1cf   : > { %v640_v24 = vpop.f32.mrf.mxu2 }
 0x1d0   : > { %v694_v25 = vadd.f32 %v1552_v61, %v640_v24 }
 0x1d2   : > { %727 = vst.msk [vmem:[%s1555_s18 + $0xa0] sm:$0xff] %vm706_vm1, %v694_v25 }
 0x1d7   : > { %v642_v26 = vpop.f32.mrf.mxu2 }
 0x1d8   : > { %v695_v27 = vadd.f32 %v1552_v61, %v642_v26 }
 0x1da   : > { %728 = vst.msk [vmem:[%s1555_s18 + $0xa8] sm:$0xff] %vm706_vm1, %v695_v27 }
 0x1df   : > { %v645_v28 = vpop.f32.mrf.mxu2 }
 0x1e0   : > { %v696_v29 = vadd.f32 %v1552_v61, %v645_v28 }
 0x1e2   : > { %729 = vst.msk [vmem:[%s1555_s18 + $0xb0] sm:$0xff] %vm706_vm1, %v696_v29 }
 0x1e7   : > { %v647_v30 = vpop.f32.mrf.mxu2 }
 0x1e8   : > { %v697_v31 = vadd.f32 %v1552_v61, %v647_v30 }
 0x1ea   : > { %730 = vst.msk [vmem:[%s1555_s18 + $0xb8] sm:$0xff] %vm706_vm1, %v697_v31 }
 0x1ef   : > { %v650_v32 = vpop.f32.mrf.mxu2 }
 0x1f0   : > { %v698_v33 = vadd.f32 %v1552_v61, %v650_v32 }
 0x1f2   : > { %731 = vst.msk [vmem:[%s1555_s18 + $0xc0] sm:$0xff] %vm706_vm1, %v698_v33 }
 0x1f7   : > { %v652_v34 = vpop.f32.mrf.mxu2 }
 0x1f8   : > { %v699_v35 = vadd.f32 %v1552_v61, %v652_v34 }
 0x1fa   : > { %732 = vst.msk [vmem:[%s1555_s18 + $0xc8] sm:$0xff] %vm706_vm1, %v699_v35 }
 0x1ff   : > { %v655_v36 = vpop.f32.mrf.mxu2 }
 0x200   : > { %v700_v37 = vadd.f32 %v1552_v61, %v655_v36 }
 0x202   : > { %733 = vst.msk [vmem:[%s1555_s18 + $0xd0] sm:$0xff] %vm706_vm1, %v700_v37 }
 0x207   : > { %v657_v38 = vpop.f32.mrf.mxu2 }
 0x208   : > { %v701_v39 = vadd.f32 %v1552_v61, %v657_v38 }
 0x20a   : > { %734 = vst.msk [vmem:[%s1555_s18 + $0xd8] sm:$0xff] %vm706_vm1, %v701_v39 }
 0x20f   : > { %v660_v40 = vpop.f32.mrf.mxu2 }
 0x210   : > { %v702_v41 = vadd.f32 %v1552_v61, %v660_v40 }
 0x212   : > { %735 = vst.msk [vmem:[%s1555_s18 + $0xe0] sm:$0xff] %vm706_vm1, %v702_v41 }
 0x217   : > { %v662_v42 = vpop.f32.mrf.mxu2 }
 0x218   : > { %v703_v43 = vadd.f32 %v1552_v61, %v662_v42 }
 0x21a   : > { %736 = vst.msk [vmem:[%s1555_s18 + $0xe8] sm:$0xff] %vm706_vm1, %v703_v43 }
 0x21f   : > { %v665_v44 = vpop.f32.mrf.mxu2 }
 0x220   : > { %v704_v45 = vadd.f32 %v1552_v61, %v665_v44 }
 0x222   : > { %737 = vst.msk [vmem:[%s1555_s18 + $0xf0] sm:$0xff] %vm706_vm1, %v704_v45 }
 0x226   : > { %745 = sbr.rel (!%p1427_p4) target bundleno = 619 (0x26b), region = 44 }
 0x227   : > { %v667_v46 = vpop.f32.mrf.mxu2 }
 0x228   : > { %v705_v47 = vadd.f32 %v1552_v61, %v667_v46 }
 0x22a   : > { %738 = vst.msk [vmem:[%s1555_s18 + $0xf8] sm:$0xff] %vm706_vm1, %v705_v47 }
 0x22b   : > { %s1824_s24 = smov (!%p748_p8, %s747_s24), 32 }
 0x22c   : > { %s1152_s7 = sshll.u32 %s1824_s24, 3 }
 0x22d   : > { %p1155_p9 = scmp.eq.s32.totalorder %s1152_s7, 0 }
 0x22e   : > { %s1679_s8 = sshrl.u32 (!%p1155_p9), %s1824_s24, 5 }
 0x22f   : > { %756 = sbr.rel (%p1155_p9) target bundleno = 619 (0x26b), region = 48  ;;  %p1156_p10 = scmp.le.s32.totalorder (!%p1155_p9), %s1679_s8, 0 }
 0x234   : > { %1035 = sbr.rel (%p1156_p10) target bundleno = 602 (0x25a), region = 124  ;;  %s1815_s21 = smov (!%p1156_p10), %s1673_s6 }
 0x235   : > { %s1816_s26 = smov (!%p1156_p10), %s1555_s18  ;;  %s1688_s29 = smov (!%p1156_p10), 0  }
 0x236   : > { %s1690_s9 = smov (!%p1156_p10), 0  }
 0x239 LB: >> { %v881_v61 = vld [vmem:[%s1346_s26] sm:$0xff]  ;;  %v883_v49 = vld [vmem:[%s1346_s26 + $0x8] sm:$0xff]  ;;  %v885_v50 = vld [vmem:[%s1346_s26 + $0x10] sm:$0xff]  ;;  %s945_s10 = sadd.s32 1, %s1350_s29  ;;  %s875_s9 = sadd.s32 1, %s1354_s9   ;;  %s1354_s9 = sphi %s1690_s9, %s875_s9   ;;  %s1350_s29 = sphi %s1688_s29, %s1819_s29   ;;  %s1346_s26 = sphi %s1816_s26, %s1818_s26   ;;  %s1342_s21 = sphi %s1815_s21, %s1817_s21  }
 0x23a   : >> { %882 = vst [vmem:[%s1342_s21] sm:$0xff] %v881_v61  ;;  %v887_v51 = vld [vmem:[%s1346_s26 + $0x18] sm:$0xff]  ;;  %p946_p11 = scmp.ge.s32.totalorder %s945_s10, %s1679_s8  ;;  %v889_v52 = vld [vmem:[%s1346_s26 + $0x20] sm:$0xff]  ;;  %v891_v53 = vld [vmem:[%s1346_s26 + $0x28] sm:$0xff]  ;;  %p874_p12 = scmp.ge.s32.totalorder %s875_s9, %s1679_s8 }
 0x23b   : >> { %884 = vst [vmem:[%s1342_s21 + $0x8] sm:$0xff] %v883_v49  ;;  %v893_v54 = vld [vmem:[%s1346_s26 + $0x30] sm:$0xff]  ;;  %v895_v55 = vld [vmem:[%s1346_s26 + $0x38] sm:$0xff]  ;;  %v897_v56 = vld [vmem:[%s1346_s26 + $0x40] sm:$0xff] }
 0x23c   : >> { %886 = vst [vmem:[%s1342_s21 + $0x10] sm:$0xff] %v885_v50  ;;  %s1826_s10 = smov (%p946_p11, %s945_s10), 0  ;;  %v899_v57 = vld [vmem:[%s1346_s26 + $0x48] sm:$0xff]  ;;  %v901_v58 = vld [vmem:[%s1346_s26 + $0x50] sm:$0xff]  ;;  %v903_v59 = vld [vmem:[%s1346_s26 + $0x58] sm:$0xff] }
 0x23d   : >> { %888 = vst [vmem:[%s1342_s21 + $0x18] sm:$0xff] %v887_v51  ;;  %s1157_s11 = sshll.u32 %s1826_s10, 8  ;;  %v905_v60 = vld [vmem:[%s1346_s26 + $0x60] sm:$0xff]  ;;  %v907_v62 = vld [vmem:[%s1346_s26 + $0x68] sm:$0xff]  ;;  %v909_v63 = vld [vmem:[%s1346_s26 + $0x70] sm:$0xff]  ;;  %s1819_s29 = smov %s1826_s10 }
 0x23e   : >> { %890 = vst [vmem:[%s1342_s21 + $0x20] sm:$0xff] %v889_v52  ;;  %s1722_s12 = scalar_lea.vmem %s1555_s18, %s1157_s11 [#allocation2]   ;;  %s1725_s14 = scalar_lea.vmem %s1673_s6, %s1157_s11   ;;  %v911_v0 = vld [vmem:[%s1346_s26 + $0x78] sm:$0xff]  ;;  %v913_v1 = vld [vmem:[%s1346_s26 + $0x80] sm:$0xff]  ;;  %v915_v2 = vld [vmem:[%s1346_s26 + $0x88] sm:$0xff] }
 0x23f   : >> { %892 = vst [vmem:[%s1342_s21 + $0x28] sm:$0xff] %v891_v53  ;;  %v917_v3 = vld [vmem:[%s1346_s26 + $0x90] sm:$0xff]  ;;  %v919_v4 = vld [vmem:[%s1346_s26 + $0x98] sm:$0xff]  ;;  %v921_v5 = vld [vmem:[%s1346_s26 + $0xa0] sm:$0xff] }
 0x240   : >> { %894 = vst [vmem:[%s1342_s21 + $0x30] sm:$0xff] %v893_v54  ;;  %v923_v6 = vld [vmem:[%s1346_s26 + $0xa8] sm:$0xff]  ;;  %v925_v7 = vld [vmem:[%s1346_s26 + $0xb0] sm:$0xff]  ;;  %v927_v8 = vld [vmem:[%s1346_s26 + $0xb8] sm:$0xff] }
 0x241   : >> { %896 = vst [vmem:[%s1342_s21 + $0x38] sm:$0xff] %v895_v55  ;;  %v929_v9 = vld [vmem:[%s1346_s26 + $0xc0] sm:$0xff]  ;;  %v931_v10 = vld [vmem:[%s1346_s26 + $0xc8] sm:$0xff]  ;;  %v933_v11 = vld [vmem:[%s1346_s26 + $0xd0] sm:$0xff] }
 0x242   : >> { %898 = vst [vmem:[%s1342_s21 + $0x40] sm:$0xff] %v897_v56  ;;  %v935_v12 = vld [vmem:[%s1346_s26 + $0xd8] sm:$0xff]  ;;  %v937_v13 = vld [vmem:[%s1346_s26 + $0xe0] sm:$0xff]  ;;  %v939_v14 = vld [vmem:[%s1346_s26 + $0xe8] sm:$0xff] }
 0x243   : >> { %900 = vst [vmem:[%s1342_s21 + $0x48] sm:$0xff] %v899_v57  ;;  %v941_v15 = vld [vmem:[%s1346_s26 + $0xf0] sm:$0xff]  ;;  %v943_v16 = vld [vmem:[%s1346_s26 + $0xf8] sm:$0xff]  ;;  %s1818_s26 = smov %s1722_s12 }
 0x244   : >> { %902 = vst [vmem:[%s1342_s21 + $0x50] sm:$0xff] %v901_v58 }
 0x245   : >> { %904 = vst [vmem:[%s1342_s21 + $0x58] sm:$0xff] %v903_v59 }
 0x246   : >> { %906 = vst [vmem:[%s1342_s21 + $0x60] sm:$0xff] %v905_v60 }
 0x247   : >> { %908 = vst [vmem:[%s1342_s21 + $0x68] sm:$0xff] %v907_v62 }
 0x248   : >> { %910 = vst [vmem:[%s1342_s21 + $0x70] sm:$0xff] %v909_v63 }
 0x249   : >> { %912 = vst [vmem:[%s1342_s21 + $0x78] sm:$0xff] %v911_v0 }
 0x24a   : >> { %914 = vst [vmem:[%s1342_s21 + $0x80] sm:$0xff] %v913_v1 }
 0x24b   : >> { %916 = vst [vmem:[%s1342_s21 + $0x88] sm:$0xff] %v915_v2 }
 0x24c   : >> { %918 = vst [vmem:[%s1342_s21 + $0x90] sm:$0xff] %v917_v3 }
 0x24d   : >> { %920 = vst [vmem:[%s1342_s21 + $0x98] sm:$0xff] %v919_v4 }
 0x24e   : >> { %922 = vst [vmem:[%s1342_s21 + $0xa0] sm:$0xff] %v921_v5 }
 0x24f   : >> { %924 = vst [vmem:[%s1342_s21 + $0xa8] sm:$0xff] %v923_v6 }
 0x250   : >> { %926 = vst [vmem:[%s1342_s21 + $0xb0] sm:$0xff] %v925_v7 }
 0x251   : >> { %928 = vst [vmem:[%s1342_s21 + $0xb8] sm:$0xff] %v927_v8 }
 0x252   : >> { %930 = vst [vmem:[%s1342_s21 + $0xc0] sm:$0xff] %v929_v9 }
 0x253   : >> { %932 = vst [vmem:[%s1342_s21 + $0xc8] sm:$0xff] %v931_v10 }
 0x254   : >> { %934 = vst [vmem:[%s1342_s21 + $0xd0] sm:$0xff] %v933_v11 }
 0x255   : >> { %936 = vst [vmem:[%s1342_s21 + $0xd8] sm:$0xff] %v935_v12  ;;  %877 = sbr.rel (!%p874_p12) target bundleno = 569 (0x239), region = 130 }
 0x256   : >> { %938 = vst [vmem:[%s1342_s21 + $0xe0] sm:$0xff] %v937_v13 }
 0x257   : >> { %940 = vst [vmem:[%s1342_s21 + $0xe8] sm:$0xff] %v939_v14 }
 0x258   : >> { %942 = vst [vmem:[%s1342_s21 + $0xf0] sm:$0xff] %v941_v15 }
 0x259   : >> { %944 = vst [vmem:[%s1342_s21 + $0xf8] sm:$0xff] %v943_v16  ;;  %s1817_s21 = smov %s1725_s14 }
 0x25a PF: > { %s1790_s15 = sand.u32 31, %s1824_s24   ;;  %s1180_s16 = sshll.u32 %s1679_s8, 8 }
 0x25b   : > { %s956_s13 = scalar_lea.vmem %s1555_s18, %s1180_s16 [#allocation2]   ;;  %s958_s17 = scalar_lea.vmem %s1673_s6, %s1180_s16  }
 0x25c   : > { %p1162_p13 = scmp.le.s32.totalorder %s1790_s15, 0 }
 0x25d   : > { %s1356_s20 = smov (!%p1162_p13), %s958_s17   ;;  %s1360_s23 = smov (!%p1162_p13), %s956_s13  }
 0x25e   : > { %1049 = sbr.rel (%p1162_p13) target bundleno = 619 (0x26b), region = 135  ;;  %s1364_s27 = smov (!%p1162_p13), 0  }
 0x25f   : > { %s1368_s28 = smov (!%p1162_p13), 0  }
 0x263 LB: >> { %v968_v48 = vld [vmem:[%s1362_s23] sm:$0xff]  ;;  %s970_s24 = sadd.s32 1, %s1366_s27  ;;  %s962_s28 = sadd.s32 1, %s1370_s28   ;;  %s1370_s28 = sphi %s1368_s28, %s962_s28   ;;  %s1366_s27 = sphi %s1364_s27, %s1365_s27   ;;  %s1362_s23 = sphi %s1360_s23, %s975_s23   ;;  %s1358_s20 = sphi %s1356_s20, %s976_s20  }
 0x264   : >> { %969 = vst [vmem:[%s1358_s20] sm:$0xff] %v968_v48  ;;  %p971_p0 = scmp.ge.s32.totalorder %s970_s24, %s1790_s15  ;;  %p961_p1 = scmp.ge.s32.totalorder %s962_s28, %s1790_s15 }
 0x266   : >> { %s1828_s24 = smov (%p971_p0, %s970_s24), 0  ;;  %964 = sbr.rel (!%p961_p1) target bundleno = 611 (0x263), region = 141 }
 0x267   : >> { %s1163_s18 = sshll.u32 %s1828_s24, 3  ;;  %s1365_s27 = smov %s1828_s24  }
 0x268   : >> { %s975_s23 = scalar_lea.vmem %s956_s13, %s1163_s18 [#allocation2]   ;;  %s976_s20 = scalar_lea.vmem %s958_s17, %s1163_s18  }
 0x26b PF: > { %p12_p2 = scmp.ge.s32.totalorder %s1417_s22, 4   ;;  %s1820_s18 = smov %s1334_s19 }
 0x26c   : > { %s1821_s19 = smov %s1425_s25  ;;  %s1822_s20 = smov %s1417_s22 }
 0x26d   :  { %14 = sbr.rel (!%p12_p2) target bundleno = 2 (0x2), region = 152 }

</bundles_post_ra>
